<compile_context>
chip_gen: v7x
topology: tpu7x:2x2x1
jax: 0.10.0
libtpu: 0.0.40
codegen_flags: <defaults>
</compile_context>

<pallas_src>
import functools

import jax
import jax.numpy as jnp
from jax.experimental import pallas as pl
from jax.experimental.pallas import tpu as pltpu

EPS = 1e-5                         # PyTorch BatchNorm2d default
INTERSTAGE_DTYPE = jnp.bfloat16    # pre-BN activations round-tripped via HBM
VMEM_LIMIT = 48 * 1024 * 1024      # keep below v7x's 64 MiB physical VMEM


# ---------------------------------------------------------------------------
# Kernel 1: [optional fused BN+ReLU of previous stage] -> depthwise 3x3 ->
#           pointwise 1x1 -> per-image BN partial sums.  One grid step = one
#           image, activations as (C, H*W) with H*W on the lane axis.
# ---------------------------------------------------------------------------
def _conv_stage_kernel(x_ref, mask_ref, dww_ref, dwb_ref, pww_ref, pwb_ref,
                       scale_ref, shift_ref, z_ref, stats_ref,
                       *, W, fuse_input_norm):
    cin = x_ref.shape[1]
    hw = x_ref.shape[2]
    cout = pwb_ref.shape[0]

    x = x_ref[0].astype(jnp.float32)                        # (Cin, HW)
    if fuse_input_norm:
        # Previous stage's BatchNorm + ReLU fused into this stage's prologue.
        x = jnp.maximum(x * scale_ref[...] + shift_ref[...], 0.0)

    # ---- depthwise 3x3: per tap, a lane roll (XLU) + per-channel weight
    #      (sublane broadcast) + precomputed zero-padding mask (lane broadcast).
    acc = None
    for k in range(9):
        dy, dx = k // 3 - 1, k % 3 - 1
        shift = (-(dy * W + dx)) % hw                       # static, >= 0
        xs = x if shift == 0 else pltpu.roll(x, shift=shift, axis=1)
        term = xs * dww_ref[:, k:k + 1]                     # (Cin, HW)
        if (dy, dx) != (0, 0):
            term = term * mask_ref[k:k + 1, :]              # zero image halo
        acc = term if acc is None else acc + term
    dw_out = acc + dwb_ref[...]                             # + depthwise bias

    # ---- pointwise 1x1 conv.
    if cin >= 32:
        # Large channel counts: the contraction is worth the MXU.
        z = jnp.dot(pww_ref[...], dw_out, preferred_element_type=jnp.float32)
    else:
        # Tiny channel counts (wnet test shapes): Cin rank-1 VPU updates beat
        # an MXU matmul with K = Cin << 128.
        z = None
        for ci in range(cin):
            contrib = pww_ref[:, ci:ci + 1] * dw_out[ci:ci + 1, :]  # (Cout,HW)
            z = contrib if z is None else z + contrib
    z = z + pwb_ref[...]                                    # + pointwise bias

    # ---- per-image BatchNorm partial sums (f32), reduced across N in wrapper.
    s1 = jnp.sum(z, axis=1, keepdims=True)                  # (Cout, 1)
    s2 = jnp.sum(z * z, axis=1, keepdims=True)              # (Cout, 1)

    z_ref[0] = z.astype(z_ref.dtype)                        # bf16 inter-stage
    stats_ref[0] = jnp.concatenate([s1, s2], axis=1)        # (Cout, 2) f32


def _conv_stage(x, masks, dww, dwb, pww, pwb, scale_in, shift_in, *,
                W, fuse_input_norm):
    N, Cin, HW = x.shape
    Cout = pww.shape[0]
    kern = functools.partial(_conv_stage_kernel, W=W,
                             fuse_input_norm=fuse_input_norm)
    return pl.pallas_call(
        kern,
        grid=(N,),
        in_specs=[
            pl.BlockSpec((1, Cin, HW), lambda n: (n, 0, 0)),   # activations
            pl.BlockSpec((9, HW), lambda n: (0, 0)),           # tap masks
            pl.BlockSpec((Cin, 9), lambda n: (0, 0)),          # dw weights
            pl.BlockSpec((Cin, 1), lambda n: (0, 0)),          # dw bias
            pl.BlockSpec((Cout, Cin), lambda n: (0, 0)),       # pw weights
            pl.BlockSpec((Cout, 1), lambda n: (0, 0)),         # pw bias
            pl.BlockSpec((Cin, 1), lambda n: (0, 0)),          # fused BN scale
            pl.BlockSpec((Cin, 1), lambda n: (0, 0)),          # fused BN shift
        ],
        out_specs=(
            pl.BlockSpec((1, Cout, HW), lambda n: (n, 0, 0)),  # pre-BN conv out
            pl.BlockSpec((1, Cout, 2), lambda n: (n, 0, 0)),   # per-image stats
        ),
        out_shape=(
            jax.ShapeDtypeStruct((N, Cout, HW), INTERSTAGE_DTYPE),
            jax.ShapeDtypeStruct((N, Cout, 2), jnp.float32),
        ),
        compiler_params=pltpu.CompilerParams(
            dimension_semantics=("parallel",),       # megacore split on v7x
            vmem_limit_bytes=VMEM_LIMIT),
    )(x, masks, dww, dwb, pww, pwb, scale_in, shift_in)


# ---------------------------------------------------------------------------
# Kernel 2: final BatchNorm + ReLU, written directly in NCHW-flat f32 layout.
# ---------------------------------------------------------------------------
def _bn_relu_kernel(z_ref, scale_ref, shift_ref, o_ref):
    z = z_ref[0].astype(jnp.float32)
    o_ref[0] = jnp.maximum(z * scale_ref[...] + shift_ref[...], 0.0)


def _bn_relu(z, scale, shift):
    N, C, HW = z.shape
    return pl.pallas_call(
        _bn_relu_kernel,
        grid=(N,),
        in_specs=[
            pl.BlockSpec((1, C, HW), lambda n: (n, 0, 0)),
            pl.BlockSpec((C, 1), lambda n: (0, 0)),
            pl.BlockSpec((C, 1), lambda n: (0, 0)),
        ],
        out_specs=pl.BlockSpec((1, C, HW), lambda n: (n, 0, 0)),
        out_shape=jax.ShapeDtypeStruct((N, C, HW), jnp.float32),
        compiler_params=pltpu.CompilerParams(
            dimension_semantics=("parallel",),
            vmem_limit_bytes=VMEM_LIMIT),
    )(z, scale, shift)


def _bn_scale_shift(stats, gamma, beta, count):
    """Finalize training-mode BN: per-channel scale/shift from partial sums."""
    tot = jnp.sum(stats, axis=0)                            # (C, 2)
    mean = tot[:, 0:1] / count                              # (C, 1)
    var = jnp.maximum(tot[:, 1:2] / count - mean * mean, 0.0)   # biased var
    inv = jax.lax.rsqrt(var + EPS)
    scale = gamma * inv                                     # (C, 1)
    shift = beta - mean * scale                             # (C, 1)
    return scale, shift


def block_forward(x_nchw, params):
    """Equivalent of Block.forward (separable=True).  NCHW in, NCHW out."""
    N, Cin, H, W = x_nchw.shape
    Cout = params["pw1_b"].shape[0]
    HW = H * W
    f32 = jnp.float32

    # ---- per-tap zero-padding masks over the flat spatial axis (static) ----
    hh = jnp.arange(H, dtype=jnp.int32).reshape(H, 1)
    ww = jnp.arange(W, dtype=jnp.int32).reshape(1, W)
    mask_rows = []
    for k in range(9):
        dy, dx = k // 3 - 1, k % 3 - 1
        ok = ((hh + dy >= 0) & (hh + dy < H) & (ww + dx >= 0) & (ww + dx < W))
        mask_rows.append(ok.reshape(1, HW))
    masks = jnp.concatenate(mask_rows, axis=0).astype(f32)      # (9, HW)

    # ---- parameters in kernel layout (done once, outside the kernels) ----
    dw1 = params["dw1_w"].reshape(9, Cin).T.astype(f32)          # (Cin, 9)
    db1 = params["dw1_b"].reshape(Cin, 1).astype(f32)
    pw1 = params["pw1_w"].T.astype(f32)                          # (Cout, Cin)
    pb1 = params["pw1_b"].reshape(Cout, 1).astype(f32)
    g1 = params["bn1_g"].reshape(Cout, 1).astype(f32)
    b1 = params["bn1_b"].reshape(Cout, 1).astype(f32)
    dw2 = params["dw2_w"].reshape(9, Cout).T.astype(f32)         # (Cout, 9)
    db2 = params["dw2_b"].reshape(Cout, 1).astype(f32)
    pw2 = params["pw2_w"].T.astype(f32)                          # (Cout, Cout)
    pb2 = params["pw2_b"].reshape(Cout, 1).astype(f32)
    g2 = params["bn2_g"].reshape(Cout, 1).astype(f32)
    b2 = params["bn2_b"].reshape(Cout, 1).astype(f32)

    # NCHW already matches the kernel layout: just flatten H*W onto lanes.
    x = x_nchw.reshape(N, Cin, HW).astype(f32)

    count = N * HW
    ones = jnp.ones((Cin, 1), f32)
    zeros = jnp.zeros((Cin, 1), f32)

    # Stage 1: conv (no input norm) + BN partials.
    z1, st1 = _conv_stage(x, masks, dw1, db1, pw1, pb1, ones, zeros,
                          W=W, fuse_input_norm=False)
    scale1, shift1 = _bn_scale_shift(st1, g1, b1, count)

    # Stage 2: fused BN1+ReLU prologue, then conv + BN partials.
    z2, st2 = _conv_stage(z1, masks, dw2, db2, pw2, pb2, scale1, shift1,
                          W=W, fuse_input_norm=True)
    scale2, shift2 = _bn_scale_shift(st2, g2, b2, count)

    # Final normalize + ReLU, already in NCHW-flat layout.
    y = _bn_relu(z2, scale2, shift2)                             # (N,Cout,HW)
    return y.reshape(N, Cout, H, W)


# ---------------------------------------------------------------------------
# Pure-JAX reference (correctness check) and synthetic parameters.
# ---------------------------------------------------------------------------
def _ref_forward(x_nchw, params):
    hi = jax.lax.Precision.HIGHEST

    def dw_conv(x, w_hwc, b):
        c = x.shape[1]
        w = jnp.transpose(w_hwc, (2, 0, 1))[:, None, :, :]       # (C,1,3,3)
        y = jax.lax.conv_general_dilated(
            x, w, window_strides=(1, 1), padding=((1, 1), (1, 1)),
            dimension_numbers=("NCHW", "OIHW", "NCHW"),
            feature_group_count=c, precision=hi)
        return y + b[None, :, None, None]

    def pw_conv(x, w_io, b):
        w = jnp.transpose(w_io, (1, 0))[:, :, None, None]        # (Cout,Cin,1,1)
        y = jax.lax.conv_general_dilated(
            x, w, window_strides=(1, 1), padding=((0, 0), (0, 0)),
            dimension_numbers=("NCHW", "OIHW", "NCHW"), precision=hi)
        return y + b[None, :, None, None]

    def bn_relu(x, g, b):
        mean = jnp.mean(x, axis=(0, 2, 3), keepdims=True)
        var = jnp.mean(jnp.square(x - mean), axis=(0, 2, 3), keepdims=True)
        y = (x - mean) * jax.lax.rsqrt(var + EPS)
        return jnp.maximum(y * g[None, :, None, None] + b[None, :, None, None],
                           0.0)

    h = bn_relu(pw_conv(dw_conv(x_nchw, params["dw1_w"], params["dw1_b"]),
                        params["pw1_w"], params["pw1_b"]),
                params["bn1_g"], params["bn1_b"])
    h = bn_relu(pw_conv(dw_conv(h, params["dw2_w"], params["dw2_b"]),
                        params["pw2_w"], params["pw2_b"]),
                params["bn2_g"], params["bn2_b"])
    return h


def init_params(key, in_filters, out_filters):
    """Deterministic synthetic parameters matching the PyTorch module shapes."""
    ks = jax.random.split(key, 12)
    f32 = jnp.float32
    sp1_w = 0.2 * jax.random.normal(ks[0], (in_filters, 1, 3, 3), f32)
    sp1_b = 0.1 * jax.random.normal(ks[1], (in_filters,), f32)
    dp1_w = 0.2 * jax.random.normal(ks[2], (out_filters, in_filters, 1, 1), f32)
    dp1_b = 0.1 * jax.random.normal(ks[3], (out_filters,), f32)
    sp2_w = 0.2 * jax.random.normal(ks[4], (out_filters, 1, 3, 3), f32)
    sp2_b = 0.1 * jax.random.normal(ks[5], (out_filters,), f32)
    dp2_w = 0.2 * jax.random.normal(ks[6], (out_filters, out_filters, 1, 1), f32)
    dp2_b = 0.1 * jax.random.normal(ks[7], (out_filters,), f32)
    bn1_g = 1.0 + 0.1 * jax.random.normal(ks[8], (out_filters,), f32)
    bn1_b = 0.1 * jax.random.normal(ks[9], (out_filters,), f32)
    bn2_g = 1.0 + 0.1 * jax.random.normal(ks[10], (out_filters,), f32)
    bn2_b = 0.1 * jax.random.normal(ks[11], (out_filters,), f32)

    return {
        # depthwise weights: torch (C,1,3,3) -> (3,3,C)  [ky, kx, c]
        "dw1_w": jnp.transpose(sp1_w[:, 0, :, :], (1, 2, 0)),
        "dw1_b": sp1_b,
        # pointwise weights: torch (Cout,Cin,1,1) -> (Cin, Cout)
        "pw1_w": jnp.transpose(dp1_w[:, :, 0, 0], (1, 0)),
        "pw1_b": dp1_b,
        "bn1_g": bn1_g, "bn1_b": bn1_b,
        "dw2_w": jnp.transpose(sp2_w[:, 0, :, :], (1, 2, 0)),
        "dw2_b": sp2_b,
        "pw2_w": jnp.transpose(dp2_w[:, :, 0, 0], (1, 0)),
        "pw2_b": dp2_b,
        "bn2_g": bn2_g, "bn2_b": bn2_b,
    }


if __name__ == "__main__":
    N, Cin, Cout, H, W = 2, 4, 8, 16, 16
    key = jax.random.PRNGKey(0)
    k_x, k_p = jax.random.split(key)
    x = jax.random.normal(k_x, (N, Cin, H, W), jnp.float32)    # PyTorch NCHW
    params = init_params(k_p, Cin, Cout)

    out = jax.jit(block_forward)(x, params)
    out = jax.block_until_ready(out)

    assert out.shape == (N, Cout, H, W), out.shape
    assert bool(jnp.all(jnp.isfinite(out)))
    assert bool(jnp.all(out >= 0.0))                           # ReLU output

    # Numerical check vs a plain-JAX reference.  Tolerance is loose because
    # the inter-stage pre-BN activations are stored in bf16 (values are O(1),
    # BN amplifies the bf16 rounding by gamma/std).
    ref = jax.block_until_ready(jax.jit(_ref_forward)(x, params))
    err = float(jnp.max(jnp.abs(out - ref)))
    assert err < 0.2, f"max abs err vs reference = {err}"

    print("KERNEL_OK")
</pallas_src>

<mosaic_0001>
module attributes {stable_mosaic.version = 11 : i64} {
  func.func @_conv_stage_kernel(%arg0: i32, %arg1: memref<1x4x256xf32, #tpu.memory_space<vmem>>, %arg2: memref<9x256xf32, #tpu.memory_space<vmem>>, %arg3: memref<4x9xf32, #tpu.memory_space<vmem>>, %arg4: memref<4x1xf32, #tpu.memory_space<vmem>>, %arg5: memref<8x4xf32, #tpu.memory_space<vmem>>, %arg6: memref<8x1xf32, #tpu.memory_space<vmem>>, %arg7: memref<4x1xf32, #tpu.memory_space<vmem>>, %arg8: memref<4x1xf32, #tpu.memory_space<vmem>>, %arg9: memref<1x8x256xbf16, #tpu.memory_space<vmem>>, %arg10: memref<1x8x2xf32, #tpu.memory_space<vmem>>) attributes {dimension_semantics = [#tpu.dimension_semantics<parallel>], iteration_bounds = array<i64: 2>, scalar_prefetch = 0 : i64, scratch_operands = 0 : i64, tpu.core_type = #tpu.core_type<tc>, window_params = [{transform_indices = @transform_0, window_bounds = array<i64: 1, 4, 256>}, {pipeline_mode = #tpu.pipeline_mode<synchronous>, transform_indices = @transform_1, window_bounds = array<i64: 9, 256>}, {pipeline_mode = #tpu.pipeline_mode<synchronous>, transform_indices = @transform_2, window_bounds = array<i64: 4, 9>}, {pipeline_mode = #tpu.pipeline_mode<synchronous>, transform_indices = @transform_3, window_bounds = array<i64: 4, 1>}, {pipeline_mode = #tpu.pipeline_mode<synchronous>, transform_indices = @transform_4, window_bounds = array<i64: 8, 4>}, {pipeline_mode = #tpu.pipeline_mode<synchronous>, transform_indices = @transform_5, window_bounds = array<i64: 8, 1>}, {pipeline_mode = #tpu.pipeline_mode<synchronous>, transform_indices = @transform_6, window_bounds = array<i64: 4, 1>}, {pipeline_mode = #tpu.pipeline_mode<synchronous>, transform_indices = @transform_7, window_bounds = array<i64: 4, 1>}, {transform_indices = @transform_8, window_bounds = array<i64: 1, 8, 256>}, {transform_indices = @transform_9, window_bounds = array<i64: 1, 8, 2>}]} {
    %c0 = arith.constant 0 : index
    %c0_0 = arith.constant 0 : index
    %c0_1 = arith.constant 0 : index
    %0 = vector.load %arg1[%c0, %c0_0, %c0_1] : memref<1x4x256xf32, #tpu.memory_space<vmem>>, vector<1x4x256xf32>
    %1 = vector.shape_cast %0 : vector<1x4x256xf32> to vector<4x256xf32>
    %c17_i32 = arith.constant 17 : i32
    %2 = tpu.dynamic_rotate %1 by %c17_i32 dim 1 : vector<4x256xf32>, i32 -> vector<4x256xf32>
    %c0_2 = arith.constant 0 : index
    %c0_3 = arith.constant 0 : index
    %3 = vector.load %arg3[%c0_2, %c0_3] : memref<4x9xf32, #tpu.memory_space<vmem>>, vector<4x1xf32>
    %4 = vector.broadcast %3 : vector<4x1xf32> to vector<4x256xf32>
    %5 = arith.mulf %2, %4 : vector<4x256xf32>
    %c0_4 = arith.constant 0 : index
    %c0_5 = arith.constant 0 : index
    %6 = vector.load %arg2[%c0_4, %c0_5] : memref<9x256xf32, #tpu.memory_space<vmem>>, vector<1x256xf32>
    %7 = vector.broadcast %6 : vector<1x256xf32> to vector<4x256xf32>
    %8 = arith.mulf %5, %7 : vector<4x256xf32>
    %c16_i32 = arith.constant 16 : i32
    %9 = tpu.dynamic_rotate %1 by %c16_i32 dim 1 : vector<4x256xf32>, i32 -> vector<4x256xf32>
    %c0_6 = arith.constant 0 : index
    %c1 = arith.constant 1 : index
    %10 = vector.load %arg3[%c0_6, %c1] : memref<4x9xf32, #tpu.memory_space<vmem>>, vector<4x1xf32>
    %11 = vector.broadcast %10 : vector<4x1xf32> to vector<4x256xf32>
    %12 = arith.mulf %9, %11 : vector<4x256xf32>
    %c1_7 = arith.constant 1 : index
    %c0_8 = arith.constant 0 : index
    %13 = vector.load %arg2[%c1_7, %c0_8] : memref<9x256xf32, #tpu.memory_space<vmem>>, vector<1x256xf32>
    %14 = vector.broadcast %13 : vector<1x256xf32> to vector<4x256xf32>
    %15 = arith.mulf %12, %14 : vector<4x256xf32>
    %16 = arith.addf %8, %15 : vector<4x256xf32>
    %c15_i32 = arith.constant 15 : i32
    %17 = tpu.dynamic_rotate %1 by %c15_i32 dim 1 : vector<4x256xf32>, i32 -> vector<4x256xf32>
    %c0_9 = arith.constant 0 : index
    %c2 = arith.constant 2 : index
    %18 = vector.load %arg3[%c0_9, %c2] : memref<4x9xf32, #tpu.memory_space<vmem>>, vector<4x1xf32>
    %19 = vector.broadcast %18 : vector<4x1xf32> to vector<4x256xf32>
    %20 = arith.mulf %17, %19 : vector<4x256xf32>
    %c2_10 = arith.constant 2 : index
    %c0_11 = arith.constant 0 : index
    %21 = vector.load %arg2[%c2_10, %c0_11] : memref<9x256xf32, #tpu.memory_space<vmem>>, vector<1x256xf32>
    %22 = vector.broadcast %21 : vector<1x256xf32> to vector<4x256xf32>
    %23 = arith.mulf %20, %22 : vector<4x256xf32>
    %24 = arith.addf %16, %23 : vector<4x256xf32>
    %c1_i32 = arith.constant 1 : i32
    %25 = tpu.dynamic_rotate %1 by %c1_i32 dim 1 : vector<4x256xf32>, i32 -> vector<4x256xf32>
    %c0_12 = arith.constant 0 : index
    %c3 = arith.constant 3 : index
    %26 = vector.load %arg3[%c0_12, %c3] : memref<4x9xf32, #tpu.memory_space<vmem>>, vector<4x1xf32>
    %27 = vector.broadcast %26 : vector<4x1xf32> to vector<4x256xf32>
    %28 = arith.mulf %25, %27 : vector<4x256xf32>
    %c3_13 = arith.constant 3 : index
    %c0_14 = arith.constant 0 : index
    %29 = vector.load %arg2[%c3_13, %c0_14] : memref<9x256xf32, #tpu.memory_space<vmem>>, vector<1x256xf32>
    %30 = vector.broadcast %29 : vector<1x256xf32> to vector<4x256xf32>
    %31 = arith.mulf %28, %30 : vector<4x256xf32>
    %32 = arith.addf %24, %31 : vector<4x256xf32>
    %c0_15 = arith.constant 0 : index
    %c4 = arith.constant 4 : index
    %33 = vector.load %arg3[%c0_15, %c4] : memref<4x9xf32, #tpu.memory_space<vmem>>, vector<4x1xf32>
    %34 = vector.broadcast %33 : vector<4x1xf32> to vector<4x256xf32>
    %35 = arith.mulf %1, %34 : vector<4x256xf32>
    %36 = arith.addf %32, %35 : vector<4x256xf32>
    %c255_i32 = arith.constant 255 : i32
    %37 = tpu.dynamic_rotate %1 by %c255_i32 dim 1 : vector<4x256xf32>, i32 -> vector<4x256xf32>
    %c0_16 = arith.constant 0 : index
    %c5 = arith.constant 5 : index
    %38 = vector.load %arg3[%c0_16, %c5] : memref<4x9xf32, #tpu.memory_space<vmem>>, vector<4x1xf32>
    %39 = vector.broadcast %38 : vector<4x1xf32> to vector<4x256xf32>
    %40 = arith.mulf %37, %39 : vector<4x256xf32>
    %c5_17 = arith.constant 5 : index
    %c0_18 = arith.constant 0 : index
    %41 = vector.load %arg2[%c5_17, %c0_18] : memref<9x256xf32, #tpu.memory_space<vmem>>, vector<1x256xf32>
    %42 = vector.broadcast %41 : vector<1x256xf32> to vector<4x256xf32>
    %43 = arith.mulf %40, %42 : vector<4x256xf32>
    %44 = arith.addf %36, %43 : vector<4x256xf32>
    %c241_i32 = arith.constant 241 : i32
    %45 = tpu.dynamic_rotate %1 by %c241_i32 dim 1 : vector<4x256xf32>, i32 -> vector<4x256xf32>
    %c0_19 = arith.constant 0 : index
    %c6 = arith.constant 6 : index
    %46 = vector.load %arg3[%c0_19, %c6] : memref<4x9xf32, #tpu.memory_space<vmem>>, vector<4x1xf32>
    %47 = vector.broadcast %46 : vector<4x1xf32> to vector<4x256xf32>
    %48 = arith.mulf %45, %47 : vector<4x256xf32>
    %c6_20 = arith.constant 6 : index
    %c0_21 = arith.constant 0 : index
    %49 = vector.load %arg2[%c6_20, %c0_21] : memref<9x256xf32, #tpu.memory_space<vmem>>, vector<1x256xf32>
    %50 = vector.broadcast %49 : vector<1x256xf32> to vector<4x256xf32>
    %51 = arith.mulf %48, %50 : vector<4x256xf32>
    %52 = arith.addf %44, %51 : vector<4x256xf32>
    %c240_i32 = arith.constant 240 : i32
    %53 = tpu.dynamic_rotate %1 by %c240_i32 dim 1 : vector<4x256xf32>, i32 -> vector<4x256xf32>
    %c0_22 = arith.constant 0 : index
    %c7 = arith.constant 7 : index
    %54 = vector.load %arg3[%c0_22, %c7] : memref<4x9xf32, #tpu.memory_space<vmem>>, vector<4x1xf32>
    %55 = vector.broadcast %54 : vector<4x1xf32> to vector<4x256xf32>
    %56 = arith.mulf %53, %55 : vector<4x256xf32>
    %c7_23 = arith.constant 7 : index
    %c0_24 = arith.constant 0 : index
    %57 = vector.load %arg2[%c7_23, %c0_24] : memref<9x256xf32, #tpu.memory_space<vmem>>, vector<1x256xf32>
    %58 = vector.broadcast %57 : vector<1x256xf32> to vector<4x256xf32>
    %59 = arith.mulf %56, %58 : vector<4x256xf32>
    %60 = arith.addf %52, %59 : vector<4x256xf32>
    %c239_i32 = arith.constant 239 : i32
    %61 = tpu.dynamic_rotate %1 by %c239_i32 dim 1 : vector<4x256xf32>, i32 -> vector<4x256xf32>
    %c0_25 = arith.constant 0 : index
    %c8 = arith.constant 8 : index
    %62 = vector.load %arg3[%c0_25, %c8] : memref<4x9xf32, #tpu.memory_space<vmem>>, vector<4x1xf32>
    %63 = vector.broadcast %62 : vector<4x1xf32> to vector<4x256xf32>
    %64 = arith.mulf %61, %63 : vector<4x256xf32>
    %c8_26 = arith.constant 8 : index
    %c0_27 = arith.constant 0 : index
    %65 = vector.load %arg2[%c8_26, %c0_27] : memref<9x256xf32, #tpu.memory_space<vmem>>, vector<1x256xf32>
    %66 = vector.broadcast %65 : vector<1x256xf32> to vector<4x256xf32>
    %67 = arith.mulf %64, %66 : vector<4x256xf32>
    %68 = arith.addf %60, %67 : vector<4x256xf32>
    %c0_28 = arith.constant 0 : index
    %c0_29 = arith.constant 0 : index
    %69 = vector.load %arg4[%c0_28, %c0_29] : memref<4x1xf32, #tpu.memory_space<vmem>>, vector<4x1xf32>
    %70 = vector.broadcast %69 : vector<4x1xf32> to vector<4x256xf32>
    %71 = arith.addf %68, %70 : vector<4x256xf32>
    %c0_30 = arith.constant 0 : index
    %c0_31 = arith.constant 0 : index
    %72 = vector.load %arg5[%c0_30, %c0_31] : memref<8x4xf32, #tpu.memory_space<vmem>>, vector<8x1xf32>
    %73 = vector.extract_strided_slice %71 {offsets = [0, 0], sizes = [1, 256], strides = [1, 1]} : vector<4x256xf32> to vector<1x256xf32>
    %74 = vector.broadcast %72 : vector<8x1xf32> to vector<8x256xf32>
    %75 = vector.broadcast %73 : vector<1x256xf32> to vector<8x256xf32>
    %76 = arith.mulf %74, %75 : vector<8x256xf32>
    %c0_32 = arith.constant 0 : index
    %c1_33 = arith.constant 1 : index
    %77 = vector.load %arg5[%c0_32, %c1_33] : memref<8x4xf32, #tpu.memory_space<vmem>>, vector<8x1xf32>
    %78 = vector.extract_strided_slice %71 {offsets = [1, 0], sizes = [1, 256], strides = [1, 1]} : vector<4x256xf32> to vector<1x256xf32>
    %79 = vector.broadcast %77 : vector<8x1xf32> to vector<8x256xf32>
    %80 = vector.broadcast %78 : vector<1x256xf32> to vector<8x256xf32>
    %81 = arith.mulf %79, %80 : vector<8x256xf32>
    %82 = arith.addf %76, %81 : vector<8x256xf32>
    %c0_34 = arith.constant 0 : index
    %c2_35 = arith.constant 2 : index
    %83 = vector.load %arg5[%c0_34, %c2_35] : memref<8x4xf32, #tpu.memory_space<vmem>>, vector<8x1xf32>
    %84 = vector.extract_strided_slice %71 {offsets = [2, 0], sizes = [1, 256], strides = [1, 1]} : vector<4x256xf32> to vector<1x256xf32>
    %85 = vector.broadcast %83 : vector<8x1xf32> to vector<8x256xf32>
    %86 = vector.broadcast %84 : vector<1x256xf32> to vector<8x256xf32>
    %87 = arith.mulf %85, %86 : vector<8x256xf32>
    %88 = arith.addf %82, %87 : vector<8x256xf32>
    %c0_36 = arith.constant 0 : index
    %c3_37 = arith.constant 3 : index
    %89 = vector.load %arg5[%c0_36, %c3_37] : memref<8x4xf32, #tpu.memory_space<vmem>>, vector<8x1xf32>
    %90 = vector.extract_strided_slice %71 {offsets = [3, 0], sizes = [1, 256], strides = [1, 1]} : vector<4x256xf32> to vector<1x256xf32>
    %91 = vector.broadcast %89 : vector<8x1xf32> to vector<8x256xf32>
    %92 = vector.broadcast %90 : vector<1x256xf32> to vector<8x256xf32>
    %93 = arith.mulf %91, %92 : vector<8x256xf32>
    %94 = arith.addf %88, %93 : vector<8x256xf32>
    %c0_38 = arith.constant 0 : index
    %c0_39 = arith.constant 0 : index
    %95 = vector.load %arg6[%c0_38, %c0_39] : memref<8x1xf32, #tpu.memory_space<vmem>>, vector<8x1xf32>
    %96 = vector.broadcast %95 : vector<8x1xf32> to vector<8x256xf32>
    %97 = arith.addf %94, %96 : vector<8x256xf32>
    %cst = arith.constant dense<0.000000e+00> : vector<8xf32>
    %98 = vector.multi_reduction <add>, %97, %cst [1] : vector<8x256xf32> to vector<8xf32>
    %99 = vector.shape_cast %98 : vector<8xf32> to vector<8x1xf32>
    %100 = arith.mulf %97, %97 : vector<8x256xf32>
    %cst_40 = arith.constant dense<0.000000e+00> : vector<8xf32>
    %101 = vector.multi_reduction <add>, %100, %cst_40 [1] : vector<8x256xf32> to vector<8xf32>
    %102 = vector.shape_cast %101 : vector<8xf32> to vector<8x1xf32>
    %103 = arith.truncf %97 : vector<8x256xf32> to vector<8x256xbf16>
    %c0_41 = arith.constant 0 : index
    %c0_42 = arith.constant 0 : index
    %c0_43 = arith.constant 0 : index
    %104 = vector.load %arg9[%c0_41, %c0_42, %c0_43] : memref<1x8x256xbf16, #tpu.memory_space<vmem>>, vector<1x8x256xbf16>
    %105 = vector.shape_cast %104 : vector<1x8x256xbf16> to vector<8x256xbf16>
    %106 = vector.shape_cast %103 : vector<8x256xbf16> to vector<1x8x256xbf16>
    tpu.vector_store %arg9[%c0_41, %c0_42, %c0_43], %106 {strides = array<i32>} : memref<1x8x256xbf16, #tpu.memory_space<vmem>>, vector<1x8x256xbf16>,
    %107 = tpu.concatenate %99, %102 in 1 : vector<8x1xf32>, vector<8x1xf32> -> vector<8x2xf32>
    %c0_44 = arith.constant 0 : index
    %c0_45 = arith.constant 0 : index
    %c0_46 = arith.constant 0 : index
    %108 = vector.load %arg10[%c0_44, %c0_45, %c0_46] : memref<1x8x2xf32, #tpu.memory_space<vmem>>, vector<1x8x2xf32>
    %109 = vector.shape_cast %108 : vector<1x8x2xf32> to vector<8x2xf32>
    %110 = vector.shape_cast %107 : vector<8x2xf32> to vector<1x8x2xf32>
    tpu.vector_store %arg10[%c0_44, %c0_45, %c0_46], %110 {strides = array<i32>} : memref<1x8x2xf32, #tpu.memory_space<vmem>>, vector<1x8x2xf32>,
    return
  }
  func.func @transform_0(%arg0: i32) -> (i32, i32, i32) {
    %c0_i32 = arith.constant 0 : i32
    %c0_i32_0 = arith.constant 0 : i32
    %c0_i32_1 = arith.constant 0 : i32
    return %arg0, %c0_i32, %c0_i32_0 : i32, i32, i32
  }
  func.func @transform_1(%arg0: i32) -> (i32, i32) {
    %c0_i32 = arith.constant 0 : i32
    %c0_i32_0 = arith.constant 0 : i32
    %c0_i32_1 = arith.constant 0 : i32
    return %c0_i32, %c0_i32_0 : i32, i32
  }
  func.func @transform_2(%arg0: i32) -> (i32, i32) {
    %c0_i32 = arith.constant 0 : i32
    %c0_i32_0 = arith.constant 0 : i32
    %c0_i32_1 = arith.constant 0 : i32
    return %c0_i32, %c0_i32_0 : i32, i32
  }
  func.func @transform_3(%arg0: i32) -> (i32, i32) {
    %c0_i32 = arith.constant 0 : i32
    %c0_i32_0 = arith.constant 0 : i32
    %c0_i32_1 = arith.constant 0 : i32
    return %c0_i32, %c0_i32_0 : i32, i32
  }
  func.func @transform_4(%arg0: i32) -> (i32, i32) {
    %c0_i32 = arith.constant 0 : i32
    %c0_i32_0 = arith.constant 0 : i32
    %c0_i32_1 = arith.constant 0 : i32
    return %c0_i32, %c0_i32_0 : i32, i32
  }
  func.func @transform_5(%arg0: i32) -> (i32, i32) {
    %c0_i32 = arith.constant 0 : i32
    %c0_i32_0 = arith.constant 0 : i32
    %c0_i32_1 = arith.constant 0 : i32
    return %c0_i32, %c0_i32_0 : i32, i32
  }
  func.func @transform_6(%arg0: i32) -> (i32, i32) {
    %c0_i32 = arith.constant 0 : i32
    %c0_i32_0 = arith.constant 0 : i32
    %c0_i32_1 = arith.constant 0 : i32
    return %c0_i32, %c0_i32_0 : i32, i32
  }
  func.func @transform_7(%arg0: i32) -> (i32, i32) {
    %c0_i32 = arith.constant 0 : i32
    %c0_i32_0 = arith.constant 0 : i32
    %c0_i32_1 = arith.constant 0 : i32
    return %c0_i32, %c0_i32_0 : i32, i32
  }
  func.func @transform_8(%arg0: i32) -> (i32, i32, i32) {
    %c0_i32 = arith.constant 0 : i32
    %c0_i32_0 = arith.constant 0 : i32
    %c0_i32_1 = arith.constant 0 : i32
    return %arg0, %c0_i32, %c0_i32_0 : i32, i32, i32
  }
  func.func @transform_9(%arg0: i32) -> (i32, i32, i32) {
    %c0_i32 = arith.constant 0 : i32
    %c0_i32_0 = arith.constant 0 : i32
    %c0_i32_1 = arith.constant 0 : i32
    return %arg0, %c0_i32, %c0_i32_0 : i32, i32, i32
  }
}

module attributes {stable_mosaic.version = 11 : i64} {
  func.func @_bn_relu_kernel(%arg0: i32, %arg1: memref<1x8x256xbf16, #tpu.memory_space<vmem>>, %arg2: memref<8x1xf32, #tpu.memory_space<vmem>>, %arg3: memref<8x1xf32, #tpu.memory_space<vmem>>, %arg4: memref<1x8x256xf32, #tpu.memory_space<vmem>>) attributes {dimension_semantics = [#tpu.dimension_semantics<parallel>], iteration_bounds = array<i64: 2>, scalar_prefetch = 0 : i64, scratch_operands = 0 : i64, tpu.core_type = #tpu.core_type<tc>, window_params = [{transform_indices = @transform_0, window_bounds = array<i64: 1, 8, 256>}, {pipeline_mode = #tpu.pipeline_mode<synchronous>, transform_indices = @transform_1, window_bounds = array<i64: 8, 1>}, {pipeline_mode = #tpu.pipeline_mode<synchronous>, transform_indices = @transform_2, window_bounds = array<i64: 8, 1>}, {transform_indices = @transform_3, window_bounds = array<i64: 1, 8, 256>}]} {
    %c0 = arith.constant 0 : index
    %c0_0 = arith.constant 0 : index
    %c0_1 = arith.constant 0 : index
    %0 = vector.load %arg1[%c0, %c0_0, %c0_1] : memref<1x8x256xbf16, #tpu.memory_space<vmem>>, vector<1x8x256xbf16>
    %1 = vector.shape_cast %0 : vector<1x8x256xbf16> to vector<8x256xbf16>
    %2 = arith.extf %1 : vector<8x256xbf16> to vector<8x256xf32>
    %c0_2 = arith.constant 0 : index
    %c0_3 = arith.constant 0 : index
    %3 = vector.load %arg2[%c0_2, %c0_3] : memref<8x1xf32, #tpu.memory_space<vmem>>, vector<8x1xf32>
    %4 = vector.broadcast %3 : vector<8x1xf32> to vector<8x256xf32>
    %5 = arith.mulf %2, %4 : vector<8x256xf32>
    %c0_4 = arith.constant 0 : index
    %c0_5 = arith.constant 0 : index
    %6 = vector.load %arg3[%c0_4, %c0_5] : memref<8x1xf32, #tpu.memory_space<vmem>>, vector<8x1xf32>
    %7 = vector.broadcast %6 : vector<8x1xf32> to vector<8x256xf32>
    %8 = arith.addf %5, %7 : vector<8x256xf32>
    %cst = arith.constant 0.000000e+00 : f32
    %9 = vector.broadcast %cst : f32 to vector<8x256xf32>
    %10 = arith.maximumf %8, %9 : vector<8x256xf32>
    %c0_6 = arith.constant 0 : index
    %c0_7 = arith.constant 0 : index
    %c0_8 = arith.constant 0 : index
    %11 = vector.load %arg4[%c0_6, %c0_7, %c0_8] : memref<1x8x256xf32, #tpu.memory_space<vmem>>, vector<1x8x256xf32>
    %12 = vector.shape_cast %11 : vector<1x8x256xf32> to vector<8x256xf32>
    %13 = vector.shape_cast %10 : vector<8x256xf32> to vector<1x8x256xf32>
    tpu.vector_store %arg4[%c0_6, %c0_7, %c0_8], %13 {strides = array<i32>} : memref<1x8x256xf32, #tpu.memory_space<vmem>>, vector<1x8x256xf32>,
    return
  }
  func.func @transform_0(%arg0: i32) -> (i32, i32, i32) {
    %c0_i32 = arith.constant 0 : i32
    %c0_i32_0 = arith.constant 0 : i32
    %c0_i32_1 = arith.constant 0 : i32
    return %arg0, %c0_i32, %c0_i32_0 : i32, i32, i32
  }
  func.func @transform_1(%arg0: i32) -> (i32, i32) {
    %c0_i32 = arith.constant 0 : i32
    %c0_i32_0 = arith.constant 0 : i32
    %c0_i32_1 = arith.constant 0 : i32
    return %c0_i32, %c0_i32_0 : i32, i32
  }
  func.func @transform_2(%arg0: i32) -> (i32, i32) {
    %c0_i32 = arith.constant 0 : i32
    %c0_i32_0 = arith.constant 0 : i32
    %c0_i32_1 = arith.constant 0 : i32
    return %c0_i32, %c0_i32_0 : i32, i32
  }
  func.func @transform_3(%arg0: i32) -> (i32, i32, i32) {
    %c0_i32 = arith.constant 0 : i32
    %c0_i32_0 = arith.constant 0 : i32
    %c0_i32_1 = arith.constant 0 : i32
    return %arg0, %c0_i32, %c0_i32_0 : i32, i32, i32
  }
}

module attributes {stable_mosaic.version = 11 : i64} {
  func.func @_conv_stage_kernel(%arg0: i32, %arg1: memref<1x8x256xbf16, #tpu.memory_space<vmem>>, %arg2: memref<9x256xf32, #tpu.memory_space<vmem>>, %arg3: memref<8x9xf32, #tpu.memory_space<vmem>>, %arg4: memref<8x1xf32, #tpu.memory_space<vmem>>, %arg5: memref<8x8xf32, #tpu.memory_space<vmem>>, %arg6: memref<8x1xf32, #tpu.memory_space<vmem>>, %arg7: memref<8x1xf32, #tpu.memory_space<vmem>>, %arg8: memref<8x1xf32, #tpu.memory_space<vmem>>, %arg9: memref<1x8x256xbf16, #tpu.memory_space<vmem>>, %arg10: memref<1x8x2xf32, #tpu.memory_space<vmem>>) attributes {dimension_semantics = [#tpu.dimension_semantics<parallel>], iteration_bounds = array<i64: 2>, scalar_prefetch = 0 : i64, scratch_operands = 0 : i64, tpu.core_type = #tpu.core_type<tc>, window_params = [{transform_indices = @transform_0, window_bounds = array<i64: 1, 8, 256>}, {pipeline_mode = #tpu.pipeline_mode<synchronous>, transform_indices = @transform_1, window_bounds = array<i64: 9, 256>}, {pipeline_mode = #tpu.pipeline_mode<synchronous>, transform_indices = @transform_2, window_bounds = array<i64: 8, 9>}, {pipeline_mode = #tpu.pipeline_mode<synchronous>, transform_indices = @transform_3, window_bounds = array<i64: 8, 1>}, {pipeline_mode = #tpu.pipeline_mode<synchronous>, transform_indices = @transform_4, window_bounds = array<i64: 8, 8>}, {pipeline_mode = #tpu.pipeline_mode<synchronous>, transform_indices = @transform_5, window_bounds = array<i64: 8, 1>}, {pipeline_mode = #tpu.pipeline_mode<synchronous>, transform_indices = @transform_6, window_bounds = array<i64: 8, 1>}, {pipeline_mode = #tpu.pipeline_mode<synchronous>, transform_indices = @transform_7, window_bounds = array<i64: 8, 1>}, {transform_indices = @transform_8, window_bounds = array<i64: 1, 8, 256>}, {transform_indices = @transform_9, window_bounds = array<i64: 1, 8, 2>}]} {
    %c0 = arith.constant 0 : index
    %c0_0 = arith.constant 0 : index
    %c0_1 = arith.constant 0 : index
    %0 = vector.load %arg1[%c0, %c0_0, %c0_1] : memref<1x8x256xbf16, #tpu.memory_space<vmem>>, vector<1x8x256xbf16>
    %1 = vector.shape_cast %0 : vector<1x8x256xbf16> to vector<8x256xbf16>
    %2 = arith.extf %1 : vector<8x256xbf16> to vector<8x256xf32>
    %c0_2 = arith.constant 0 : index
    %c0_3 = arith.constant 0 : index
    %3 = vector.load %arg7[%c0_2, %c0_3] : memref<8x1xf32, #tpu.memory_space<vmem>>, vector<8x1xf32>
    %4 = vector.broadcast %3 : vector<8x1xf32> to vector<8x256xf32>
    %5 = arith.mulf %2, %4 : vector<8x256xf32>
    %c0_4 = arith.constant 0 : index
    %c0_5 = arith.constant 0 : index
    %6 = vector.load %arg8[%c0_4, %c0_5] : memref<8x1xf32, #tpu.memory_space<vmem>>, vector<8x1xf32>
    %7 = vector.broadcast %6 : vector<8x1xf32> to vector<8x256xf32>
    %8 = arith.addf %5, %7 : vector<8x256xf32>
    %cst = arith.constant 0.000000e+00 : f32
    %9 = vector.broadcast %cst : f32 to vector<8x256xf32>
    %10 = arith.maximumf %8, %9 : vector<8x256xf32>
    %c17_i32 = arith.constant 17 : i32
    %11 = tpu.dynamic_rotate %10 by %c17_i32 dim 1 : vector<8x256xf32>, i32 -> vector<8x256xf32>
    %c0_6 = arith.constant 0 : index
    %c0_7 = arith.constant 0 : index
    %12 = vector.load %arg3[%c0_6, %c0_7] : memref<8x9xf32, #tpu.memory_space<vmem>>, vector<8x1xf32>
    %13 = vector.broadcast %12 : vector<8x1xf32> to vector<8x256xf32>
    %14 = arith.mulf %11, %13 : vector<8x256xf32>
    %c0_8 = arith.constant 0 : index
    %c0_9 = arith.constant 0 : index
    %15 = vector.load %arg2[%c0_8, %c0_9] : memref<9x256xf32, #tpu.memory_space<vmem>>, vector<1x256xf32>
    %16 = vector.broadcast %15 : vector<1x256xf32> to vector<8x256xf32>
    %17 = arith.mulf %14, %16 : vector<8x256xf32>
    %c16_i32 = arith.constant 16 : i32
    %18 = tpu.dynamic_rotate %10 by %c16_i32 dim 1 : vector<8x256xf32>, i32 -> vector<8x256xf32>
    %c0_10 = arith.constant 0 : index
    %c1 = arith.constant 1 : index
    %19 = vector.load %arg3[%c0_10, %c1] : memref<8x9xf32, #tpu.memory_space<vmem>>, vector<8x1xf32>
    %20 = vector.broadcast %19 : vector<8x1xf32> to vector<8x256xf32>
    %21 = arith.mulf %18, %20 : vector<8x256xf32>
    %c1_11 = arith.constant 1 : index
    %c0_12 = arith.constant 0 : index
    %22 = vector.load %arg2[%c1_11, %c0_12] : memref<9x256xf32, #tpu.memory_space<vmem>>, vector<1x256xf32>
    %23 = vector.broadcast %22 : vector<1x256xf32> to vector<8x256xf32>
    %24 = arith.mulf %21, %23 : vector<8x256xf32>
    %25 = arith.addf %17, %24 : vector<8x256xf32>
    %c15_i32 = arith.constant 15 : i32
    %26 = tpu.dynamic_rotate %10 by %c15_i32 dim 1 : vector<8x256xf32>, i32 -> vector<8x256xf32>
    %c0_13 = arith.constant 0 : index
    %c2 = arith.constant 2 : index
    %27 = vector.load %arg3[%c0_13, %c2] : memref<8x9xf32, #tpu.memory_space<vmem>>, vector<8x1xf32>
    %28 = vector.broadcast %27 : vector<8x1xf32> to vector<8x256xf32>
    %29 = arith.mulf %26, %28 : vector<8x256xf32>
    %c2_14 = arith.constant 2 : index
    %c0_15 = arith.constant 0 : index
    %30 = vector.load %arg2[%c2_14, %c0_15] : memref<9x256xf32, #tpu.memory_space<vmem>>, vector<1x256xf32>
    %31 = vector.broadcast %30 : vector<1x256xf32> to vector<8x256xf32>
    %32 = arith.mulf %29, %31 : vector<8x256xf32>
    %33 = arith.addf %25, %32 : vector<8x256xf32>
    %c1_i32 = arith.constant 1 : i32
    %34 = tpu.dynamic_rotate %10 by %c1_i32 dim 1 : vector<8x256xf32>, i32 -> vector<8x256xf32>
    %c0_16 = arith.constant 0 : index
    %c3 = arith.constant 3 : index
    %35 = vector.load %arg3[%c0_16, %c3] : memref<8x9xf32, #tpu.memory_space<vmem>>, vector<8x1xf32>
    %36 = vector.broadcast %35 : vector<8x1xf32> to vector<8x256xf32>
    %37 = arith.mulf %34, %36 : vector<8x256xf32>
    %c3_17 = arith.constant 3 : index
    %c0_18 = arith.constant 0 : index
    %38 = vector.load %arg2[%c3_17, %c0_18] : memref<9x256xf32, #tpu.memory_space<vmem>>, vector<1x256xf32>
    %39 = vector.broadcast %38 : vector<1x256xf32> to vector<8x256xf32>
    %40 = arith.mulf %37, %39 : vector<8x256xf32>
    %41 = arith.addf %33, %40 : vector<8x256xf32>
    %c0_19 = arith.constant 0 : index
    %c4 = arith.constant 4 : index
    %42 = vector.load %arg3[%c0_19, %c4] : memref<8x9xf32, #tpu.memory_space<vmem>>, vector<8x1xf32>
    %43 = vector.broadcast %42 : vector<8x1xf32> to vector<8x256xf32>
    %44 = arith.mulf %10, %43 : vector<8x256xf32>
    %45 = arith.addf %41, %44 : vector<8x256xf32>
    %c255_i32 = arith.constant 255 : i32
    %46 = tpu.dynamic_rotate %10 by %c255_i32 dim 1 : vector<8x256xf32>, i32 -> vector<8x256xf32>
    %c0_20 = arith.constant 0 : index
    %c5 = arith.constant 5 : index
    %47 = vector.load %arg3[%c0_20, %c5] : memref<8x9xf32, #tpu.memory_space<vmem>>, vector<8x1xf32>
    %48 = vector.broadcast %47 : vector<8x1xf32> to vector<8x256xf32>
    %49 = arith.mulf %46, %48 : vector<8x256xf32>
    %c5_21 = arith.constant 5 : index
    %c0_22 = arith.constant 0 : index
    %50 = vector.load %arg2[%c5_21, %c0_22] : memref<9x256xf32, #tpu.memory_space<vmem>>, vector<1x256xf32>
    %51 = vector.broadcast %50 : vector<1x256xf32> to vector<8x256xf32>
    %52 = arith.mulf %49, %51 : vector<8x256xf32>
    %53 = arith.addf %45, %52 : vector<8x256xf32>
    %c241_i32 = arith.constant 241 : i32
    %54 = tpu.dynamic_rotate %10 by %c241_i32 dim 1 : vector<8x256xf32>, i32 -> vector<8x256xf32>
    %c0_23 = arith.constant 0 : index
    %c6 = arith.constant 6 : index
    %55 = vector.load %arg3[%c0_23, %c6] : memref<8x9xf32, #tpu.memory_space<vmem>>, vector<8x1xf32>
    %56 = vector.broadcast %55 : vector<8x1xf32> to vector<8x256xf32>
    %57 = arith.mulf %54, %56 : vector<8x256xf32>
    %c6_24 = arith.constant 6 : index
    %c0_25 = arith.constant 0 : index
    %58 = vector.load %arg2[%c6_24, %c0_25] : memref<9x256xf32, #tpu.memory_space<vmem>>, vector<1x256xf32>
    %59 = vector.broadcast %58 : vector<1x256xf32> to vector<8x256xf32>
    %60 = arith.mulf %57, %59 : vector<8x256xf32>
    %61 = arith.addf %53, %60 : vector<8x256xf32>
    %c240_i32 = arith.constant 240 : i32
    %62 = tpu.dynamic_rotate %10 by %c240_i32 dim 1 : vector<8x256xf32>, i32 -> vector<8x256xf32>
    %c0_26 = arith.constant 0 : index
    %c7 = arith.constant 7 : index
    %63 = vector.load %arg3[%c0_26, %c7] : memref<8x9xf32, #tpu.memory_space<vmem>>, vector<8x1xf32>
    %64 = vector.broadcast %63 : vector<8x1xf32> to vector<8x256xf32>
    %65 = arith.mulf %62, %64 : vector<8x256xf32>
    %c7_27 = arith.constant 7 : index
    %c0_28 = arith.constant 0 : index
    %66 = vector.load %arg2[%c7_27, %c0_28] : memref<9x256xf32, #tpu.memory_space<vmem>>, vector<1x256xf32>
    %67 = vector.broadcast %66 : vector<1x256xf32> to vector<8x256xf32>
    %68 = arith.mulf %65, %67 : vector<8x256xf32>
    %69 = arith.addf %61, %68 : vector<8x256xf32>
    %c239_i32 = arith.constant 239 : i32
    %70 = tpu.dynamic_rotate %10 by %c239_i32 dim 1 : vector<8x256xf32>, i32 -> vector<8x256xf32>
    %c0_29 = arith.constant 0 : index
    %c8 = arith.constant 8 : index
    %71 = vector.load %arg3[%c0_29, %c8] : memref<8x9xf32, #tpu.memory_space<vmem>>, vector<8x1xf32>
    %72 = vector.broadcast %71 : vector<8x1xf32> to vector<8x256xf32>
    %73 = arith.mulf %70, %72 : vector<8x256xf32>
    %c8_30 = arith.constant 8 : index
    %c0_31 = arith.constant 0 : index
    %74 = vector.load %arg2[%c8_30, %c0_31] : memref<9x256xf32, #tpu.memory_space<vmem>>, vector<1x256xf32>
    %75 = vector.broadcast %74 : vector<1x256xf32> to vector<8x256xf32>
    %76 = arith.mulf %73, %75 : vector<8x256xf32>
    %77 = arith.addf %69, %76 : vector<8x256xf32>
    %c0_32 = arith.constant 0 : index
    %c0_33 = arith.constant 0 : index
    %78 = vector.load %arg4[%c0_32, %c0_33] : memref<8x1xf32, #tpu.memory_space<vmem>>, vector<8x1xf32>
    %79 = vector.broadcast %78 : vector<8x1xf32> to vector<8x256xf32>
    %80 = arith.addf %77, %79 : vector<8x256xf32>
    %c0_34 = arith.constant 0 : index
    %c0_35 = arith.constant 0 : index
    %81 = vector.load %arg5[%c0_34, %c0_35] : memref<8x8xf32, #tpu.memory_space<vmem>>, vector<8x1xf32>
    %82 = vector.extract_strided_slice %80 {offsets = [0, 0], sizes = [1, 256], strides = [1, 1]} : vector<8x256xf32> to vector<1x256xf32>
    %83 = vector.broadcast %81 : vector<8x1xf32> to vector<8x256xf32>
    %84 = vector.broadcast %82 : vector<1x256xf32> to vector<8x256xf32>
    %85 = arith.mulf %83, %84 : vector<8x256xf32>
    %c0_36 = arith.constant 0 : index
    %c1_37 = arith.constant 1 : index
    %86 = vector.load %arg5[%c0_36, %c1_37] : memref<8x8xf32, #tpu.memory_space<vmem>>, vector<8x1xf32>
    %87 = vector.extract_strided_slice %80 {offsets = [1, 0], sizes = [1, 256], strides = [1, 1]} : vector<8x256xf32> to vector<1x256xf32>
    %88 = vector.broadcast %86 : vector<8x1xf32> to vector<8x256xf32>
    %89 = vector.broadcast %87 : vector<1x256xf32> to vector<8x256xf32>
    %90 = arith.mulf %88, %89 : vector<8x256xf32>
    %91 = arith.addf %85, %90 : vector<8x256xf32>
    %c0_38 = arith.constant 0 : index
    %c2_39 = arith.constant 2 : index
    %92 = vector.load %arg5[%c0_38, %c2_39] : memref<8x8xf32, #tpu.memory_space<vmem>>, vector<8x1xf32>
    %93 = vector.extract_strided_slice %80 {offsets = [2, 0], sizes = [1, 256], strides = [1, 1]} : vector<8x256xf32> to vector<1x256xf32>
    %94 = vector.broadcast %92 : vector<8x1xf32> to vector<8x256xf32>
    %95 = vector.broadcast %93 : vector<1x256xf32> to vector<8x256xf32>
    %96 = arith.mulf %94, %95 : vector<8x256xf32>
    %97 = arith.addf %91, %96 : vector<8x256xf32>
    %c0_40 = arith.constant 0 : index
    %c3_41 = arith.constant 3 : index
    %98 = vector.load %arg5[%c0_40, %c3_41] : memref<8x8xf32, #tpu.memory_space<vmem>>, vector<8x1xf32>
    %99 = vector.extract_strided_slice %80 {offsets = [3, 0], sizes = [1, 256], strides = [1, 1]} : vector<8x256xf32> to vector<1x256xf32>
    %100 = vector.broadcast %98 : vector<8x1xf32> to vector<8x256xf32>
    %101 = vector.broadcast %99 : vector<1x256xf32> to vector<8x256xf32>
    %102 = arith.mulf %100, %101 : vector<8x256xf32>
    %103 = arith.addf %97, %102 : vector<8x256xf32>
    %c0_42 = arith.constant 0 : index
    %c4_43 = arith.constant 4 : index
    %104 = vector.load %arg5[%c0_42, %c4_43] : memref<8x8xf32, #tpu.memory_space<vmem>>, vector<8x1xf32>
    %105 = vector.extract_strided_slice %80 {offsets = [4, 0], sizes = [1, 256], strides = [1, 1]} : vector<8x256xf32> to vector<1x256xf32>
    %106 = vector.broadcast %104 : vector<8x1xf32> to vector<8x256xf32>
    %107 = vector.broadcast %105 : vector<1x256xf32> to vector<8x256xf32>
    %108 = arith.mulf %106, %107 : vector<8x256xf32>
    %109 = arith.addf %103, %108 : vector<8x256xf32>
    %c0_44 = arith.constant 0 : index
    %c5_45 = arith.constant 5 : index
    %110 = vector.load %arg5[%c0_44, %c5_45] : memref<8x8xf32, #tpu.memory_space<vmem>>, vector<8x1xf32>
    %111 = vector.extract_strided_slice %80 {offsets = [5, 0], sizes = [1, 256], strides = [1, 1]} : vector<8x256xf32> to vector<1x256xf32>
    %112 = vector.broadcast %110 : vector<8x1xf32> to vector<8x256xf32>
    %113 = vector.broadcast %111 : vector<1x256xf32> to vector<8x256xf32>
    %114 = arith.mulf %112, %113 : vector<8x256xf32>
    %115 = arith.addf %109, %114 : vector<8x256xf32>
    %c0_46 = arith.constant 0 : index
    %c6_47 = arith.constant 6 : index
    %116 = vector.load %arg5[%c0_46, %c6_47] : memref<8x8xf32, #tpu.memory_space<vmem>>, vector<8x1xf32>
    %117 = vector.extract_strided_slice %80 {offsets = [6, 0], sizes = [1, 256], strides = [1, 1]} : vector<8x256xf32> to vector<1x256xf32>
    %118 = vector.broadcast %116 : vector<8x1xf32> to vector<8x256xf32>
    %119 = vector.broadcast %117 : vector<1x256xf32> to vector<8x256xf32>
    %120 = arith.mulf %118, %119 : vector<8x256xf32>
    %121 = arith.addf %115, %120 : vector<8x256xf32>
    %c0_48 = arith.constant 0 : index
    %c7_49 = arith.constant 7 : index
    %122 = vector.load %arg5[%c0_48, %c7_49] : memref<8x8xf32, #tpu.memory_space<vmem>>, vector<8x1xf32>
    %123 = vector.extract_strided_slice %80 {offsets = [7, 0], sizes = [1, 256], strides = [1, 1]} : vector<8x256xf32> to vector<1x256xf32>
    %124 = vector.broadcast %122 : vector<8x1xf32> to vector<8x256xf32>
    %125 = vector.broadcast %123 : vector<1x256xf32> to vector<8x256xf32>
    %126 = arith.mulf %124, %125 : vector<8x256xf32>
    %127 = arith.addf %121, %126 : vector<8x256xf32>
    %c0_50 = arith.constant 0 : index
    %c0_51 = arith.constant 0 : index
    %128 = vector.load %arg6[%c0_50, %c0_51] : memref<8x1xf32, #tpu.memory_space<vmem>>, vector<8x1xf32>
    %129 = vector.broadcast %128 : vector<8x1xf32> to vector<8x256xf32>
    %130 = arith.addf %127, %129 : vector<8x256xf32>
    %cst_52 = arith.constant dense<0.000000e+00> : vector<8xf32>
    %131 = vector.multi_reduction <add>, %130, %cst_52 [1] : vector<8x256xf32> to vector<8xf32>
    %132 = vector.shape_cast %131 : vector<8xf32> to vector<8x1xf32>
    %133 = arith.mulf %130, %130 : vector<8x256xf32>
    %cst_53 = arith.constant dense<0.000000e+00> : vector<8xf32>
    %134 = vector.multi_reduction <add>, %133, %cst_53 [1] : vector<8x256xf32> to vector<8xf32>
    %135 = vector.shape_cast %134 : vector<8xf32> to vector<8x1xf32>
    %136 = arith.truncf %130 : vector<8x256xf32> to vector<8x256xbf16>
    %c0_54 = arith.constant 0 : index
    %c0_55 = arith.constant 0 : index
    %c0_56 = arith.constant 0 : index
    %137 = vector.load %arg9[%c0_54, %c0_55, %c0_56] : memref<1x8x256xbf16, #tpu.memory_space<vmem>>, vector<1x8x256xbf16>
    %138 = vector.shape_cast %137 : vector<1x8x256xbf16> to vector<8x256xbf16>
    %139 = vector.shape_cast %136 : vector<8x256xbf16> to vector<1x8x256xbf16>
    tpu.vector_store %arg9[%c0_54, %c0_55, %c0_56], %139 {strides = array<i32>} : memref<1x8x256xbf16, #tpu.memory_space<vmem>>, vector<1x8x256xbf16>,
    %140 = tpu.concatenate %132, %135 in 1 : vector<8x1xf32>, vector<8x1xf32> -> vector<8x2xf32>
    %c0_57 = arith.constant 0 : index
    %c0_58 = arith.constant 0 : index
    %c0_59 = arith.constant 0 : index
    %141 = vector.load %arg10[%c0_57, %c0_58, %c0_59] : memref<1x8x2xf32, #tpu.memory_space<vmem>>, vector<1x8x2xf32>
    %142 = vector.shape_cast %141 : vector<1x8x2xf32> to vector<8x2xf32>
    %143 = vector.shape_cast %140 : vector<8x2xf32> to vector<1x8x2xf32>
    tpu.vector_store %arg10[%c0_57, %c0_58, %c0_59], %143 {strides = array<i32>} : memref<1x8x2xf32, #tpu.memory_space<vmem>>, vector<1x8x2xf32>,
    return
  }
  func.func @transform_0(%arg0: i32) -> (i32, i32, i32) {
    %c0_i32 = arith.constant 0 : i32
    %c0_i32_0 = arith.constant 0 : i32
    %c0_i32_1 = arith.constant 0 : i32
    return %arg0, %c0_i32, %c0_i32_0 : i32, i32, i32
  }
  func.func @transform_1(%arg0: i32) -> (i32, i32) {
    %c0_i32 = arith.constant 0 : i32
    %c0_i32_0 = arith.constant 0 : i32
    %c0_i32_1 = arith.constant 0 : i32
    return %c0_i32, %c0_i32_0 : i32, i32
  }
  func.func @transform_2(%arg0: i32) -> (i32, i32) {
    %c0_i32 = arith.constant 0 : i32
    %c0_i32_0 = arith.constant 0 : i32
    %c0_i32_1 = arith.constant 0 : i32
    return %c0_i32, %c0_i32_0 : i32, i32
  }
  func.func @transform_3(%arg0: i32) -> (i32, i32) {
    %c0_i32 = arith.constant 0 : i32
    %c0_i32_0 = arith.constant 0 : i32
    %c0_i32_1 = arith.constant 0 : i32
    return %c0_i32, %c0_i32_0 : i32, i32
  }
  func.func @transform_4(%arg0: i32) -> (i32, i32) {
    %c0_i32 = arith.constant 0 : i32
    %c0_i32_0 = arith.constant 0 : i32
    %c0_i32_1 = arith.constant 0 : i32
    return %c0_i32, %c0_i32_0 : i32, i32
  }
  func.func @transform_5(%arg0: i32) -> (i32, i32) {
    %c0_i32 = arith.constant 0 : i32
    %c0_i32_0 = arith.constant 0 : i32
    %c0_i32_1 = arith.constant 0 : i32
    return %c0_i32, %c0_i32_0 : i32, i32
  }
  func.func @transform_6(%arg0: i32) -> (i32, i32) {
    %c0_i32 = arith.constant 0 : i32
    %c0_i32_0 = arith.constant 0 : i32
    %c0_i32_1 = arith.constant 0 : i32
    return %c0_i32, %c0_i32_0 : i32, i32
  }
  func.func @transform_7(%arg0: i32) -> (i32, i32) {
    %c0_i32 = arith.constant 0 : i32
    %c0_i32_0 = arith.constant 0 : i32
    %c0_i32_1 = arith.constant 0 : i32
    return %c0_i32, %c0_i32_0 : i32, i32
  }
  func.func @transform_8(%arg0: i32) -> (i32, i32, i32) {
    %c0_i32 = arith.constant 0 : i32
    %c0_i32_0 = arith.constant 0 : i32
    %c0_i32_1 = arith.constant 0 : i32
    return %arg0, %c0_i32, %c0_i32_0 : i32, i32, i32
  }
  func.func @transform_9(%arg0: i32) -> (i32, i32, i32) {
    %c0_i32 = arith.constant 0 : i32
    %c0_i32_0 = arith.constant 0 : i32
    %c0_i32_1 = arith.constant 0 : i32
    return %arg0, %c0_i32, %c0_i32_0 : i32, i32, i32
  }
}

</mosaic_0001>

<bundles_post_ra>
// kernel: block_forward.5
= control target key start
LH: loop header
LB: loop body
LE: loop exit
PB: predicated region body
PF: predicated region fallthrough
CT: control target
= control target key end

     0   :  { %s301_s12 = smov 0   ;;  %s324_s0 = inlined_call_operand.vmem [shape: bf16[2,8,256], index: 0, kind: input, shape index: {}]   ;;  %s325_s1 = inlined_call_operand.vmem [shape: f32[8,1], index: 1, kind: input, shape index: {}]   ;;  %s326_s2 = inlined_call_operand.vmem [shape: f32[8,1], index: 2, kind: input, shape index: {}]   ;;  %s327_s3 = inlined_call_operand.vmem [shape: f32[2,8,256], index: 3, kind: output, shape index: {}]  }
   0x1 LB: > { %s249_s13 = sadd.s32 4294967295, %s278_s12   ;;  %p253_p0 = scmp.ge.s32.totalorder %s278_s12, 1  ;;  %s278_s12 = sphi %s301_s12, %s13_s12  }
   0x2   : > { %p137_p1 = scmp.lt.s32.totalorder %s278_s12, 3 }
   0x4   : > { %p138_p2 = pnand %p253_p0, %p137_p1 }
   0x5   : > { %v174_v0 = vld [vmem:[%s325_s1] sm:$0xff] (!%p138_p2)  ;;  %v280_v1 = vmov (!%p138_p2), 0   ;;  %p161_p3 = scmp.lt.s32.totalorder (!%p138_p2), %s249_s13, 1 }
   0x6   : > { %141 = sbr.rel (%p138_p2) target bundleno = 144 (0x90), region = 32  ;;  %271 = vset.pattern.permute.xlu0 (!%p138_p2), %v280_v1  ;;  %v182_v2 = vld [vmem:[%s326_s2] sm:$0xff] (!%p138_p2) }
   0x7   : > { %177 = vperm.xlu0 (!%p138_p2), %271, %v174_v0  }
   0xb   : > { %185 = vperm.xlu0 (!%p138_p2), %271, %v182_v2  }
   0xd   : > { %s329_s13 = smov (!%p161_p3, %s249_s13), 1 }
   0xe   : > { %s260_s18 = sshll.u32 %s329_s13, 3  ;;  %s261_s22 = sshll.u32 %s329_s13, 4 }
   0xf   : > { %s165_s21 = scalar_lea.vmem %s324_s0, %s260_s18  ;;  %s170_s25 = scalar_lea.vmem %s327_s3, %s261_s22 }
  0x10   : > { %v171_v3 = vld [vmem:[%s165_s21] sm:$0xff] }
  0x11   : > { %v172_v4 = vunpack.c.l.bf16 %v171_v3  ;;  %v173_v5 = vunpack.c.h.bf16 %v171_v3 }
  0x86   : > { %v178_v6 = vpop.permute.xlu0 %177 }
  0x87   : > { %v180_v7 = vmul.f32 %v178_v6, %v172_v4  ;;  %v181_v8 = vmul.f32 %v178_v6, %v173_v5 }
  0x8a   : > { %v186_v9 = vpop.permute.xlu0 %185 }
  0x8b   : > { %v188_v10 = vadd.f32 %v186_v9, %v180_v7  ;;  %v189_v11 = vadd.f32 %v186_v9, %v181_v8 }
  0x8d   : > { %v190_v12 = vmax.f32 %v188_v10, 0.0  ;;  %v191_v13 = vmax.f32 %v189_v11, 0.0 }
  0x8f   : > { %192 = vst [vmem:[%s170_s25] sm:$0xff] %v190_v12  ;;  %193 = vst [vmem:[%s170_s25 + $0x8] sm:$0xff] %v191_v13 }
  0x90 PF: > { %s13_s12 = sadd.s32 1, %s278_s12  }
  0x91   : > { %p10_p4 = scmp.ge.s32.totalorder %s13_s12, 4  }
  0x93   :  { %12 = sbr.rel (!%p10_p4) target bundleno = 1 (0x1), region = 62 }

// kernel: block_forward.4
= control target key start
LH: loop header
LB: loop body
LE: loop exit
PB: predicated region body
PF: predicated region fallthrough
CT: control target
= control target key end

     0   :  { %s1007_s30 = smov 0   ;;  %s1193_s0 = inlined_call_operand.vmem [shape: bf16[2,8,256], index: 0, kind: input, shape index: {}]   ;;  %s1194_s1 = inlined_call_operand.vmem [shape: f32[9,256], index: 1, kind: input, shape index: {}]   ;;  %s1195_s2 = inlined_call_operand.vmem [shape: f32[8,9], index: 2, kind: input, shape index: {}]   ;;  %s1196_s3 = inlined_call_operand.vmem [shape: f32[8,1], index: 3, kind: input, shape index: {}]   ;;  %s1197_s4 = inlined_call_operand.vmem [shape: f32[8,8], index: 4, kind: input, shape index: {}]   ;;  %s1198_s5 = inlined_call_operand.vmem [shape: f32[8,1], index: 5, kind: input, shape index: {}]   ;;  %s1199_s6 = inlined_call_operand.vmem [shape: f32[8,1], index: 6, kind: input, shape index: {}]   ;;  %s1200_s7 = inlined_call_operand.vmem [shape: f32[8,1], index: 7, kind: input, shape index: {}]   ;;  %s1201_s8 = inlined_call_operand.vmem [shape: bf16[2,8,256], index: 8, kind: output, shape index: {0}]   ;;  %s1202_s9 = inlined_call_operand.vmem [shape: f32[2,8,2], index: 9, kind: output, shape index: {1}]  }
   0x1 LB: > { %s865_s10 = sadd.s32 4294967295, %s938_s30   ;;  %p869_p0 = scmp.ge.s32.totalorder %s938_s30, 1  ;;  %s938_s30 = sphi %s1007_s30, %s20_s30  }
   0x2   : > { %p290_p1 = scmp.lt.s32.totalorder %s938_s30, 3 }
   0x4   : > { %p291_p2 = pnand %p869_p0, %p290_p1 }
   0x5   : > { %v374_v0 = vld [vmem:[%s1195_s2] sm:$0xff] (!%p291_p2)  ;;  %v940_v2 = vmov (!%p291_p2), 0   ;;  %v941_v4 = vmov (!%p291_p2), 1   ;;  %v942_v5 = vmov (!%p291_p2), 5   ;;  %v943_v6 = vmov (!%p291_p2), 3   ;;  %p330_p3 = scmp.lt.s32.totalorder (!%p291_p2), %s865_s10, 1 }
   0x6   : > { %294 = sbr.rel (%p291_p2) target bundleno = 476 (0x1dc), region = 52  ;;  %v347_v1 = vld [vmem:[%s1199_s6] sm:$0xff] (!%p291_p2)  ;;  %914 = vset.pattern.permute.xlu1 (!%p291_p2), %v940_v2  ;;  %913 = vset.pattern.permute.xlu0 (!%p291_p2), %v940_v2  ;;  %v944_v7 = vmov (!%p291_p2), 6   ;;  %v945_v8 = vmov (!%p291_p2), 4   ;;  %v946_v10 = vmov (!%p291_p2), 7   ;;  %v947_v11 = vmov (!%p291_p2), 2  }
   0x7   : > { %377 = vperm.xlu1 (!%p291_p2), %914, %v374_v0   ;;  %350 = vperm.xlu0 (!%p291_p2), %913, %v347_v1   ;;  %v355_v3 = vld [vmem:[%s1200_s7] sm:$0xff] (!%p291_p2)  ;;  %v948_v12 = vmov (!%p291_p2), 8   ;;  %s949_s25 = smov (!%p291_p2), 17   ;;  %s950_s26 = smov (!%p291_p2), 16   ;;  %v369_v38 = vlaneseq (!%p291_p2)  ;;  %vm775_vm8 = vcmask (!%p291_p2), 7168   ;;  %vm777_vm9 = vcmask (!%p291_p2), 15360  }
   0x8   : > { %v614_v9 = vld [vmem:[%s1196_s3] sm:$0xff] (!%p291_p2)  ;;  %s951_s27 = smov (!%p291_p2), 15   ;;  %s952_s28 = smov (!%p291_p2), 127  }
   0x9   : > { %v622_v13 = vld [vmem:[%s1197_s4] sm:$0xff] (!%p291_p2)  ;;  %s953_s29 = smov (!%p291_p2), 1   ;;  %s955_s11 = smov (!%p291_p2), 112   ;;  %v1092_v41 = vand.u32 (!%p291_p2), 127, %v369_v38  ;;  %v1094_v42 = vshrl.u32 (!%p291_p2), %v369_v38, 7 }
   0xa   : > { %s956_s12 = smov (!%p291_p2), 111   ;;  %v750_v25 = vld [vmem:[%s1198_s5] sm:$0xff] (!%p291_p2) }
   0xb   : > { %915 = vset.pattern.permute.xlu1 (!%p291_p2), %v941_v4  ;;  %358 = vperm.xlu0 (!%p291_p2), %913, %v355_v3   ;;  %vm400_vm0 = vcmp.lt.s32.totalorder (!%p291_p2), %v1092_v41, 16  ;;  %vm371_vm1 = vcmp.lt.s32.totalorder (!%p291_p2), %v1092_v41, 17  ;;  %v1099_v45 = vsub.s32 (!%p291_p2), 0, %v1094_v42  ;;  %v382_v46 = vld [vmem:[%s1194_s1] ss:$8 sm:$0x3] (!%p291_p2) }
   0xc   : > { %404 = vperm.xlu1 (!%p291_p2), %915, %v374_v0   ;;  %vm430_vm2 = vcmp.lt.s32.totalorder (!%p291_p2), %v1092_v41, 15  ;;  %v1106_v49 = vsub.s32 (!%p291_p2), 1, %v1094_v42  ;;  %v875_v50 = vld [vmem:[%s1194_s1 + $0x1] ss:$8 sm:$0x3] (!%p291_p2)  ;;  %vm460_vm3 = vcmp.lt.s32.totalorder (!%p291_p2), %v1092_v41, 1 }
   0xd   : > { %s1204_s10 = smov (!%p330_p3, %s865_s10), 1  ;;  %v876_v55 = vld [vmem:[%s1194_s1 + $0x2] ss:$8 sm:$0x3]  ;;  %v387_v56 = vrot.slane %v382_v46, %v1099_v45  ;;  %v415_v59 = vrot.slane %v875_v50, %v1099_v45  ;;  %vm498_vm4 = vcmp.lt.s32.totalorder %v1092_v41, 127  ;;  %vm528_vm5 = vcmp.lt.s32.totalorder %v1092_v41, 113 }
   0xe   : > { %s1042_s21 = sshll.u32 %s1204_s10, 3  ;;  %s954_s10 = smov 113   ;;  %v419_v60 = vrot.slane %v875_v50, %v1106_v49  ;;  %v391_v1 = vrot.slane %v382_v46, %v1106_v49  ;;  %v878_v38 = vld [vmem:[%s1194_s1 + $0x5] ss:$8 sm:$0x3]  ;;  %vm558_vm6 = vcmp.lt.s32.totalorder %v1092_v41, 112 }
   0xf   : > { %918 = vset.pattern.permute.xlu0 %v942_v5  ;;  %s334_s24 = scalar_lea.vmem %s1193_s0, %s1042_s21  ;;  %v517_v50 = vrot.slane %v878_v38, %v1106_v49  ;;  %vm588_vm7 = vcmp.lt.s32.totalorder %v1092_v41, 111  ;;  %s339_s14 = scalar_lea.vmem %s1201_s8, %s1042_s21 }
  0x10   : > { %916 = vset.pattern.permute.xlu1 %v943_v6  ;;  %502 = vperm.xlu0 %918, %v374_v0   ;;  %v344_v14 = vld [vmem:[%s334_s24] sm:$0xff]  ;;  %s343_s17 = scalar_lea.vmem %s1202_s9, %s1042_s21 }
  0x11   : > { %464 = vperm.xlu1 %916, %v374_v0   ;;  %v345_v15 = vunpack.c.l.bf16 %v344_v14  ;;  %v346_v16 = vunpack.c.h.bf16 %v344_v14 }
  0x14   : > { %919 = vset.pattern.permute.xlu0 %v944_v7 }
  0x15   : > { %917 = vset.pattern.permute.xlu1 %v945_v8  ;;  %532 = vperm.xlu0 %919, %v374_v0  }
  0x16   : > { %487 = vperm.xlu1 %917, %v374_v0  }
  0x19   : > { %922 = vset.pattern.permute.xlu0 %v940_v2 }
  0x1a   : > { %920 = vset.pattern.permute.xlu1 %v946_v10  ;;  %617 = vperm.xlu0 %922, %v614_v9  }
  0x1b   : > { %562 = vperm.xlu1 %920, %v374_v0  }
  0x1e   : > { %923 = vset.pattern.permute.xlu0 %v947_v11 }
  0x1f   : > { %921 = vset.pattern.permute.xlu1 %v948_v12  ;;  %434 = vperm.xlu0 %923, %v374_v0  }
  0x20   : > { %592 = vperm.xlu1 %921, %v374_v0   ;;  %v877_v0 = vld [vmem:[%s1194_s1 + $0x3] ss:$8 sm:$0x3] }
  0x21   : > { %v475_v9 = vrot.slane %v877_v0, %v1099_v45  ;;  %v479_v12 = vrot.slane %v877_v0, %v1106_v49 }
  0x24   : > { %924 = vset.pattern.permute.xlu1 %v940_v2 }
  0x25   : > { %625 = vperm.xlu1 %924, %v622_v13  }
  0x29   : > { %925 = vset.pattern.permute.xlu1 %v941_v4  ;;  %v445_v4 = vrot.slane %v876_v55, %v1099_v45 }
  0x2a   : > { %639 = vperm.xlu1 %925, %v622_v13  }
  0x2e   : > { %926 = vset.pattern.permute.xlu1 %v943_v6 }
  0x86   : > { %v351_v17 = vpop.permute.xlu0 %350  ;;  %v378_v26 = vpop.permute.xlu1 %377 }
  0x87   : > { %v353_v18 = vmul.f32 %v351_v17, %v345_v15  ;;  %v354_v19 = vmul.f32 %v351_v17, %v346_v16 }
  0x8a   : > { %v359_v20 = vpop.permute.xlu0 %358 }
  0x8b   : > { %v361_v21 = vadd.f32 %v359_v20, %v353_v18  ;;  %v362_v22 = vadd.f32 %v359_v20, %v354_v19  ;;  %v405_v27 = vpop.permute.xlu1 %404 }
  0x8d   : > { %v1048_v23 = vmax.f32 %v361_v21, 0.0  ;;  %v1050_v24 = vmax.f32 %v362_v22, 0.0 }
  0x8f   : > { %367 = vrot.lane.b32.xlu0 %v1050_v24, %s949_s25  ;;  %365 = vrot.lane.b32.xlu1 %v1048_v23, %s949_s25  ;;  %v1080_v31 = vpop.permute.xlu0 %502 }
  0x90   : > { %v465_v28 = vpop.permute.xlu1 %464 }
  0x93   : > { %398 = vrot.lane.b32.xlu0 %v1050_v24, %s950_s26  ;;  %396 = vrot.lane.b32.xlu1 %v1048_v23, %s950_s26 }
  0x94   : > { %v1084_v33 = vpop.permute.xlu0 %532 }
  0x95   : > { %v1076_v29 = vpop.permute.xlu1 %487 }
  0x97   : > { %428 = vrot.lane.b32.xlu0 %v1050_v24, %s951_s27  ;;  %426 = vrot.lane.b32.xlu1 %v1048_v23, %s951_s27 }
  0x99   : > { %v1088_v35 = vpop.permute.xlu0 %617 }
  0x9a   : > { %v1078_v30 = vpop.permute.xlu1 %562 }
  0x9b   : > { %496 = vrot.lane.b32.xlu0 %v1050_v24, %s952_s28  ;;  %456 = vrot.lane.b32.xlu1 %v1048_v23, %s953_s29 }
  0x9e   : > { %v435_v37 = vpop.permute.xlu0 %434 }
  0x9f   : > { %524 = vrot.lane.b32.xlu0 %v1048_v23, %s954_s10  ;;  %458 = vrot.lane.b32.xlu1 %v1050_v24, %s953_s29  ;;  %v1082_v32 = vpop.permute.xlu1 %592 }
  0xa3   : > { %554 = vrot.lane.b32.xlu0 %v1048_v23, %s955_s11  ;;  %494 = vrot.lane.b32.xlu1 %v1048_v23, %s952_s28 }
  0xa4   : > { %v1086_v34 = vpop.permute.xlu1 %625 }
  0xa7   : > { %584 = vrot.lane.b32.xlu0 %v1048_v23, %s956_s12  ;;  %526 = vrot.lane.b32.xlu1 %v1050_v24, %s954_s10 }
  0xa9   : > { %v1090_v36 = vpop.permute.xlu1 %639 }
  0xab   : > { %655 = vperm.xlu0 %923, %v622_v13   ;;  %556 = vrot.lane.b32.xlu1 %v1050_v24, %s955_s11 }
  0xaf   : > { %928 = vset.pattern.permute.xlu0 %v942_v5  ;;  %586 = vrot.lane.b32.xlu1 %v1050_v24, %s956_s12  ;;  %v449_v5 = vrot.slane %v876_v55, %v1106_v49 }
  0xb0   : > { %703 = vperm.xlu0 %928, %v622_v13  }
  0xb3   : > { %671 = vperm.xlu1 %926, %v622_v13  }
  0xb4   : > { %931 = vset.pattern.permute.xlu0 %v940_v2 }
  0xb5   : > { %753 = vperm.xlu0 %931, %v750_v25  }
  0xb7   : > { %927 = vset.pattern.permute.xlu1 %v945_v8 }
  0xb8   : > { %687 = vperm.xlu1 %927, %v622_v13  }
  0xbc   : > { %929 = vset.pattern.permute.xlu1 %v944_v7 }
  0xbd   : > { %719 = vperm.xlu1 %929, %v622_v13  }
  0xc1   : > { %930 = vset.pattern.permute.xlu1 %v946_v10 }
  0xc2   : > { %735 = vperm.xlu1 %930, %v622_v13  }
 0x101   : > { %v368_v39 = vpop.permute.xlu0 %367  ;;  %v366_v40 = vpop.permute.xlu1 %365 }
 0x102   : > { %v372_v53 = vsel %vm371_vm1, %v366_v40, %v368_v39  ;;  %v373_v54 = vsel %vm371_vm1, %v368_v39, %v366_v40 }
 0x103   : > { %v380_v2 = vmul.f32 %v378_v26, %v373_v54  ;;  %v381_v3 = vmul.f32 %v378_v26, %v372_v53 }
 0x105   : > { %v399_v43 = vpop.permute.xlu0 %398  ;;  %v397_v44 = vpop.permute.xlu1 %396  ;;  %v394_v14 = vmul.f32 %v387_v56, %v380_v2  ;;  %v395_v15 = vmul.f32 %v391_v1, %v381_v3  ;;  %v880_v56 = vld [vmem:[%s1194_s1 + $0x7] ss:$8 sm:$0x3] }
 0x106   : > { %v401_v51 = vsel %vm400_vm0, %v397_v44, %v399_v43  ;;  %v402_v52 = vsel %vm400_vm0, %v399_v43, %v397_v44  ;;  %v577_v0 = vrot.slane %v880_v56, %v1106_v49 }
 0x107   : > { %v407_v61 = vmul.f32 %v405_v27, %v402_v52  ;;  %v408_v62 = vmul.f32 %v405_v27, %v401_v51 }
 0x109   : > { %v429_v47 = vpop.permute.xlu0 %428  ;;  %v427_v48 = vpop.permute.xlu1 %426  ;;  %v422_v10 = vmul.f32 %v415_v59, %v407_v61  ;;  %v423_v11 = vmul.f32 %v419_v60, %v408_v62 }
 0x10a   : > { %v431_v57 = vsel %vm430_vm2, %v427_v48, %v429_v47  ;;  %v432_v58 = vsel %vm430_vm2, %v429_v47, %v427_v48  ;;  %v490_v47 = vmul.f32 %v1076_v29, %v1048_v23  ;;  %v513_v48 = vrot.slane %v878_v38, %v1099_v45 }
 0x10b   : > { %v437_v6 = vmul.f32 %v435_v37, %v432_v58  ;;  %v438_v7 = vmul.f32 %v435_v37, %v431_v57  ;;  %v424_v22 = vadd.f32 %v422_v10, %v394_v14  ;;  %v425_v25 = vadd.f32 %v423_v11, %v395_v15 }
 0x10c   : > { %v491_v57 = vmul.f32 %v1076_v29, %v1050_v24 }
 0x10d   : > { %v457_v63 = vpop.permute.xlu1 %456  ;;  %v497_v8 = vpop.permute.xlu0 %496  ;;  %v452_v18 = vmul.f32 %v445_v4, %v437_v6  ;;  %v453_v19 = vmul.f32 %v449_v5, %v438_v7  ;;  %v881_v4 = vld [vmem:[%s1194_s1 + $0x10] ss:$8 sm:$0x3] }
 0x10e   : > { %v603_v10 = vrot.slane %v881_v4, %v1099_v45  ;;  %v607_v11 = vrot.slane %v881_v4, %v1106_v49 }
 0x10f   : > { %v454_v44 = vadd.f32 %v452_v18, %v424_v22  ;;  %v455_v46 = vadd.f32 %v453_v19, %v425_v25 }
 0x111   : > { %v459_v13 = vpop.permute.xlu1 %458  ;;  %v525_v26 = vpop.permute.xlu0 %524 }
 0x112   : > { %v461_v16 = vsel %vm460_vm3, %v457_v63, %v459_v13  ;;  %v462_v17 = vsel %vm460_vm3, %v459_v13, %v457_v63 }
 0x113   : > { %v467_v20 = vmul.f32 %v465_v28, %v462_v17  ;;  %v468_v21 = vmul.f32 %v465_v28, %v461_v16  ;;  %v879_v28 = vld [vmem:[%s1194_s1 + $0x6] ss:$8 sm:$0x3] }
 0x114   : > { %v543_v23 = vrot.slane %v879_v28, %v1099_v45  ;;  %v547_v61 = vrot.slane %v879_v28, %v1106_v49 }
 0x115   : > { %v482_v27 = vmul.f32 %v475_v9, %v467_v20  ;;  %v483_v37 = vmul.f32 %v479_v12, %v468_v21  ;;  %v495_v39 = vpop.permute.xlu1 %494  ;;  %v555_v60 = vpop.permute.xlu0 %554 }
 0x116   : > { %v499_v40 = vsel %vm498_vm4, %v495_v39, %v497_v8  ;;  %v500_v43 = vsel %vm498_vm4, %v497_v8, %v495_v39 }
 0x117   : > { %v484_v51 = vadd.f32 %v482_v27, %v454_v44  ;;  %v485_v52 = vadd.f32 %v483_v37, %v455_v46  ;;  %v505_v53 = vmul.f32 %v1080_v31, %v499_v40  ;;  %v506_v54 = vmul.f32 %v1080_v31, %v500_v43 }
 0x118   : > { %v573_v31 = vrot.slane %v880_v56, %v1099_v45 }
 0x119   : > { %v527_v55 = vpop.permute.xlu1 %526  ;;  %v493_v1 = vadd.f32 %v491_v57, %v485_v52  ;;  %v492_v2 = vadd.f32 %v490_v47, %v484_v51  ;;  %v520_v24 = vmul.f32 %v513_v48, %v505_v53  ;;  %v521_v29 = vmul.f32 %v517_v50, %v506_v54  ;;  %v585_v14 = vpop.permute.xlu0 %584 }
 0x11a   : > { %v529_v58 = vsel %vm528_vm5, %v525_v26, %v527_v55  ;;  %v530_v59 = vsel %vm528_vm5, %v527_v55, %v525_v26  ;;  %v676_v47 = vsub.s32 3, %v1094_v42 }
 0x11b   : > { %v535_v62 = vmul.f32 %v1084_v33, %v529_v58  ;;  %v536_v63 = vmul.f32 %v1084_v33, %v530_v59  ;;  %v522_v12 = vadd.f32 %v520_v24, %v492_v2  ;;  %v523_v13 = vadd.f32 %v521_v29, %v493_v1 }
 0x11c   : > { %v724_v1 = vsub.s32 6, %v1094_v42 }
 0x11d   : > { %v557_v3 = vpop.permute.xlu1 %556  ;;  %v550_v33 = vmul.f32 %v543_v23, %v535_v62  ;;  %v551_v7 = vmul.f32 %v547_v61, %v536_v63 }
 0x11e   : > { %v559_v5 = vsel %vm558_vm6, %v555_v60, %v557_v3  ;;  %v560_v6 = vsel %vm558_vm6, %v557_v3, %v555_v60 }
 0x11f   : > { %v565_v8 = vmul.f32 %v1078_v30, %v559_v5  ;;  %v566_v9 = vmul.f32 %v1078_v30, %v560_v6  ;;  %v552_v20 = vadd.f32 %v550_v33, %v522_v12  ;;  %v553_v41 = vadd.f32 %v551_v7, %v523_v13 }
 0x121   : > { %v580_v15 = vmul.f32 %v573_v31, %v565_v8  ;;  %v581_v16 = vmul.f32 %v577_v0, %v566_v9  ;;  %v587_v17 = vpop.permute.xlu1 %586  ;;  %v740_v8 = vsub.s32 7, %v1094_v42 }
 0x122   : > { %v589_v18 = vsel %vm588_vm7, %v585_v14, %v587_v17  ;;  %v590_v19 = vsel %vm588_vm7, %v587_v17, %v585_v14 }
 0x123   : > { %v595_v21 = vmul.f32 %v1082_v32, %v589_v18  ;;  %v596_v22 = vmul.f32 %v1082_v32, %v590_v19  ;;  %v582_v25 = vadd.f32 %v580_v15, %v552_v20  ;;  %v583_v30 = vadd.f32 %v581_v16, %v553_v41 }
 0x124   : > { %v660_v32 = vsub.s32 2, %v1094_v42 }
 0x125   : > { %v610_v26 = vmul.f32 %v603_v10, %v595_v21  ;;  %v611_v27 = vmul.f32 %v607_v11, %v596_v22 }
 0x127   : > { %v612_v37 = vadd.f32 %v610_v26, %v582_v25  ;;  %v613_v38 = vadd.f32 %v611_v27, %v583_v30 }
 0x129   : > { %v620_v39 = vadd.f32 %v1088_v35, %v612_v37  ;;  %v621_v40 = vadd.f32 %v1088_v35, %v613_v38 }
 0x12a   : > { %v656_v23 = vpop.permute.xlu0 %655 }
 0x12b   : > { %v631_v43 = vrot.slane %v620_v39, %v1099_v45  ;;  %v635_v44 = vrot.slane %v621_v40, %v1099_v45  ;;  %v645_v46 = vrot.slane %v620_v39, %v1106_v49  ;;  %v649_v28 = vrot.slane %v621_v40, %v1106_v49 }
 0x12c   : > { %v661_v52 = vrot.slane %v620_v39, %v660_v32  ;;  %v665_v53 = vrot.slane %v621_v40, %v660_v32  ;;  %v692_v45 = vsub.s32 4, %v1094_v42  ;;  %v681_v56 = vrot.slane %v621_v40, %v676_v47 }
 0x12d   : > { %v636_v48 = vmul.f32 %v631_v43, %v1086_v34  ;;  %v637_v50 = vmul.f32 %v635_v44, %v1086_v34  ;;  %v650_v51 = vmul.f32 %v645_v46, %v1090_v36  ;;  %v651_v35 = vmul.f32 %v649_v28, %v1090_v36 }
 0x12e   : > { %v677_v57 = vrot.slane %v620_v39, %v676_v47  ;;  %v666_v58 = vmul.f32 %v661_v52, %v656_v23  ;;  %v667_v59 = vmul.f32 %v665_v53, %v656_v23  ;;  %v708_v34 = vsub.s32 5, %v1094_v42 }
 0x12f   : > { %v652_v54 = vadd.f32 %v650_v51, %v636_v48  ;;  %v653_v55 = vadd.f32 %v651_v35, %v637_v50  ;;  %v697_v31 = vrot.slane %v621_v40, %v692_v45  ;;  %v693_v36 = vrot.slane %v620_v39, %v692_v45  ;;  %v704_v4 = vpop.permute.xlu0 %703 }
 0x130   : > { %v709_v5 = vrot.slane %v620_v39, %v708_v34  ;;  %v713_v6 = vrot.slane %v621_v40, %v708_v34  ;;  %v729_v11 = vrot.slane %v621_v40, %v724_v1  ;;  %v725_v13 = vrot.slane %v620_v39, %v724_v1 }
 0x131   : > { %v668_v62 = vadd.f32 %v666_v58, %v652_v54  ;;  %v669_v63 = vadd.f32 %v667_v59, %v653_v55  ;;  %v745_v18 = vrot.slane %v621_v40, %v740_v8  ;;  %v741_v19 = vrot.slane %v620_v39, %v740_v8 }
 0x132   : > { %v672_v49 = vpop.permute.xlu1 %671  ;;  %v714_v9 = vmul.f32 %v709_v5, %v704_v4  ;;  %v715_v10 = vmul.f32 %v713_v6, %v704_v4 }
 0x133   : > { %v682_v60 = vmul.f32 %v677_v57, %v672_v49  ;;  %v683_v61 = vmul.f32 %v681_v56, %v672_v49 }
 0x134   : > { %v754_v30 = vpop.permute.xlu0 %753 }
 0x135   : > { %v684_v2 = vadd.f32 %v682_v60, %v668_v62  ;;  %v685_v24 = vadd.f32 %v683_v61, %v669_v63 }
 0x137   : > { %v688_v0 = vpop.permute.xlu1 %687 }
 0x138   : > { %v698_v29 = vmul.f32 %v693_v36, %v688_v0  ;;  %v699_v3 = vmul.f32 %v697_v31, %v688_v0 }
 0x13a   : > { %v700_v33 = vadd.f32 %v698_v29, %v684_v2  ;;  %v701_v7 = vadd.f32 %v699_v3, %v685_v24 }
 0x13c   : > { %v720_v12 = vpop.permute.xlu1 %719  ;;  %v717_v14 = vadd.f32 %v715_v10, %v701_v7  ;;  %v716_v15 = vadd.f32 %v714_v9, %v700_v33 }
 0x13d   : > { %v730_v16 = vmul.f32 %v725_v13, %v720_v12  ;;  %v731_v17 = vmul.f32 %v729_v11, %v720_v12 }
 0x13f   : > { %v732_v41 = vadd.f32 %v730_v16, %v716_v15  ;;  %v733_v21 = vadd.f32 %v731_v17, %v717_v14 }
 0x141   : > { %v736_v20 = vpop.permute.xlu1 %735 }
 0x142   : > { %v746_v22 = vmul.f32 %v741_v19, %v736_v20  ;;  %v747_v25 = vmul.f32 %v745_v18, %v736_v20 }
 0x144   : > { %v748_v42 = vadd.f32 %v746_v22, %v732_v41  ;;  %v749_v26 = vadd.f32 %v747_v25, %v733_v21 }
 0x146   : > { %v756_v27 = vadd.f32 %v754_v30, %v748_v42  ;;  %v757_v37 = vadd.f32 %v754_v30, %v749_v26 }
 0x148   : > { %v887_v38 = vpack.c.bf16 %v757_v37, %v756_v27  ;;  %v758_v43 = vadd.f32 %v757_v37, %v756_v27  ;;  %v761_v44 = vmul.f32 %v756_v27, %v756_v27  ;;  %v762_v40 = vmul.f32 %v757_v37, %v757_v37 }
 0x14a   : > { %774 = vst [vmem:[%s339_s14] sm:$0xff] %v887_v38  ;;  %759 = vadd.xlane.f32.xlu1 %v758_v43  ;;  %v763_v39 = vadd.f32 %v762_v40, %v761_v44 }
 0x14c   : > { %764 = vadd.xlane.f32.xlu0 %v763_v39 }
 0x1d7   : > { %v760_v46 = vpop.xlane.xlu1 %759 }
 0x1d9   : > { %v765_v28 = vpop.xlane.xlu0 %764 }
 0x1da   : > { %v776_v32 = vsel %vm775_vm8, %v760_v46, %v765_v28 }
 0x1db   : > { %778 = vst.msk [vmem:[%s343_s17] sm:$0xff] %vm777_vm9, %v776_v32 }
 0x1dc PF: > { %s20_s30 = sadd.s32 1, %s938_s30  }
 0x1dd   : > { %p17_p4 = scmp.ge.s32.totalorder %s20_s30, 4  }
 0x1df   :  { %19 = sbr.rel (!%p17_p4) target bundleno = 1 (0x1), region = 101 }

// kernel: block_forward.3
= control target key start
LH: loop header
LB: loop body
LE: loop exit
PB: predicated region body
PF: predicated region fallthrough
CT: control target
= control target key end

     0   :  { %s948_s30 = smov 0   ;;  %s1111_s0 = inlined_call_operand.vmem [shape: f32[2,4,256], index: 0, kind: input, shape index: {}]   ;;  %s1112_s1 = inlined_call_operand.vmem [shape: f32[9,256], index: 1, kind: input, shape index: {}]   ;;  %s1113_s2 = inlined_call_operand.vmem [shape: f32[4,9], index: 2, kind: input, shape index: {}]   ;;  %s1114_s3 = inlined_call_operand.vmem [shape: f32[4,1], index: 3, kind: input, shape index: {}]   ;;  %s1115_s4 = inlined_call_operand.vmem [shape: f32[8,4], index: 4, kind: input, shape index: {}]   ;;  %s1116_s5 = inlined_call_operand.vmem [shape: f32[8,1], index: 5, kind: input, shape index: {}]   ;;  %s1117_s6 = inlined_call_operand.vmem [shape: f32[4,1], index: 6, kind: input, shape index: {}]   ;;  %s1118_s7 = inlined_call_operand.vmem [shape: f32[4,1], index: 7, kind: input, shape index: {}]   ;;  %s1119_s8 = inlined_call_operand.vmem [shape: bf16[2,8,256], index: 8, kind: output, shape index: {0}]   ;;  %s1120_s9 = inlined_call_operand.vmem [shape: f32[2,8,2], index: 9, kind: output, shape index: {1}]  }
   0x1 LB: > { %s807_s6 = sadd.s32 4294967295, %s878_s30   ;;  %p811_p0 = scmp.ge.s32.totalorder %s878_s30, 1  ;;  %s878_s30 = sphi %s948_s30, %s20_s30  }
   0x2   : > { %p290_p1 = scmp.lt.s32.totalorder %s878_s30, 3 }
   0x4   : > { %p291_p2 = pnand %p811_p0, %p290_p1 }
   0x5   : > { %v418_v0 = vld [vmem:[%s1113_s2] sm:$0xf] (!%p291_p2)  ;;  %v880_v2 = vmov (!%p291_p2), 2   ;;  %v881_v3 = vmov (!%p291_p2), 1   ;;  %p330_p3 = scmp.lt.s32.totalorder (!%p291_p2), %s807_s6, 1  ;;  %v882_v5 = vmov (!%p291_p2), 3   ;;  %v352_v32 = vlaneseq (!%p291_p2) }
   0x6   : > { %294 = sbr.rel (%p291_p2) target bundleno = 358 (0x166), region = 52  ;;  %v386_v1 = vld [vmem:[%s1113_s2] sm:$0xf] (!%p291_p2)  ;;  %857 = vset.pattern.permute.xlu1 (!%p291_p2), %v880_v2  ;;  %856 = vset.pattern.permute.xlu0 (!%p291_p2), %v881_v3  ;;  %v883_v6 = vmov (!%p291_p2), 5   ;;  %s884_s19 = smov (!%p291_p2), 17   ;;  %v885_v8 = vmov (!%p291_p2), 4  }
   0x7   : > { %421 = vperm.xlu1 (!%p291_p2), %857, %v418_v0   ;;  %389 = vperm.xlu0 (!%p291_p2), %856, %v386_v1   ;;  %v450_v4 = vld [vmem:[%s1113_s2] sm:$0xf] (!%p291_p2)  ;;  %s886_s20 = smov (!%p291_p2), 16   ;;  %s887_s21 = smov (!%p291_p2), 15   ;;  %v888_v11 = vmov (!%p291_p2), 7   ;;  %v889_v13 = vmov (!%p291_p2), 6  }
   0x8   : > { %v499_v10 = vld [vmem:[%s1113_s2] sm:$0xf] (!%p291_p2)  ;;  %s890_s28 = smov (!%p291_p2), 1   ;;  %v891_v15 = vmov (!%p291_p2), 0   ;;  %s892_s7 = smov (!%p291_p2), 127   ;;  %v894_v17 = vmov (!%p291_p2), 8  }
   0x9   : > { %v531_v12 = vld [vmem:[%s1113_s2] sm:$0xf] (!%p291_p2)  ;;  %s893_s10 = smov (!%p291_p2), 113   ;;  %s895_s13 = smov (!%p291_p2), 112   ;;  %v1015_v34 = vand.u32 (!%p291_p2), 127, %v352_v32  ;;  %v1019_v37 = vshrl.u32 (!%p291_p2), %v352_v32, 7 }
   0xa   : > { %v357_v14 = vld [vmem:[%s1113_s2] sm:$0xf] (!%p291_p2)  ;;  %s896_s14 = smov (!%p291_p2), 111   ;;  %v897_v38 = vmov (!%p291_p2), 839922192   ;;  %vm717_vm8 = vcmask (!%p291_p2), 7168  }
   0xb   : > { %858 = vset.pattern.permute.xlu1 (!%p291_p2), %v882_v5  ;;  %860 = vset.pattern.permute.xlu0 (!%p291_p2), %v883_v6  ;;  %v563_v16 = vld [vmem:[%s1113_s2] sm:$0xf] (!%p291_p2)  ;;  %vm354_vm0 = vcmp.lt.s32.totalorder (!%p291_p2), %v1015_v34, 17  ;;  %vm383_vm1 = vcmp.lt.s32.totalorder (!%p291_p2), %v1015_v34, 16  ;;  %v479_v39 = vunpack.c.l.s4 (!%p291_p2), %v897_v38  ;;  %v1027_v42 = vsub.s32 (!%p291_p2), 0, %v1019_v37 }
   0xc   : > { %453 = vperm.xlu1 (!%p291_p2), %858, %v450_v4   ;;  %v595_v18 = vld [vmem:[%s1113_s2] sm:$0xf] (!%p291_p2)  ;;  %v1030_v43 = vsub.s32 (!%p291_p2), 1, %v1019_v37  ;;  %vm415_vm2 = vcmp.lt.s32.totalorder (!%p291_p2), %v1015_v34, 15  ;;  %vm447_vm3 = vcmp.lt.s32.totalorder (!%p291_p2), %v1015_v34, 1  ;;  %vm496_vm4 = vcmp.lt.s32.totalorder (!%p291_p2), %v1015_v34, 127 }
   0xd   : > { %s1122_s6 = smov (!%p330_p3, %s807_s6), 1  ;;  %v620_v19 = vld [vmem:[%s1114_s3] sm:$0xf]  ;;  %v480_v54 = vunpack.c.0.s8 %v479_v39  ;;  %vm528_vm5 = vcmp.lt.s32.totalorder %v1015_v34, 113  ;;  %vm560_vm6 = vcmp.lt.s32.totalorder %v1015_v34, 112  ;;  %vm592_vm7 = vcmp.lt.s32.totalorder %v1015_v34, 111 }
   0xe   : > { %s967_s15 = sshll.u32 %s1122_s6, 3  ;;  %v628_v20 = vld [vmem:[%s1115_s4] sm:$0xff]  ;;  %v682_v34 = vsub.s32 3, %v1019_v37  ;;  %vm719_vm9 = vcmask 15360  }
   0xf   : > { %s334_s18 = scalar_lea.vmem %s1111_s0, %s967_s15  ;;  %v692_v21 = vld [vmem:[%s1116_s5] sm:$0xff]  ;;  %s343_s22 = scalar_lea.vmem %s1120_s9, %s967_s15 }
  0x10   : > { %v973_v7 = vld [vmem:[%s334_s18] sm:$0xff]  ;;  %859 = vset.pattern.permute.xlu1 %v885_v8 }
  0x11   : > { %348 = vrot.lane.b32.xlu0 %v973_v7, %s884_s19  ;;  %476 = vperm.xlu1 %859, %v450_v4   ;;  %v346_v9 = vcombine.high %v973_v7, %v973_v7  ;;  %v365_v40 = vld [vmem:[%s1112_s1] ss:$8 sm:$0x3]  ;;  %v817_v46 = vld [vmem:[%s1112_s1 + $0x1] ss:$8 sm:$0x3]  ;;  %v483_v4 = vsub.s32 %v480_v54, %v1019_v37 }
  0x12   : > { %v370_v50 = vrot.slane %v365_v40, %v1027_v42  ;;  %v374_v51 = vrot.slane %v365_v40, %v1030_v43  ;;  %v400_v55 = vrot.slane %v817_v46, %v1027_v42  ;;  %v404_v56 = vrot.slane %v817_v46, %v1030_v43  ;;  %v818_v59 = vld [vmem:[%s1112_s1 + $0x2] ss:$8 sm:$0x3]  ;;  %v819_v1 = vld [vmem:[%s1112_s1 + $0x3] ss:$8 sm:$0x3] }
  0x13   : > { %v436_v6 = vrot.slane %v818_v59, %v1030_v43  ;;  %v822_v46 = vld [vmem:[%s1112_s1 + $0x7] ss:$8 sm:$0x3] }
  0x14   : > { %v577_v54 = vrot.slane %v822_v46, %v1027_v42 }
  0x15   : > { %379 = vrot.lane.b32.xlu0 %v973_v7, %s886_s20  ;;  %350 = vrot.lane.b32.xlu1 %v346_v9, %s884_s19  ;;  %s339_s19 = scalar_lea.vmem %s1119_s8, %s967_s15 }
  0x16   : > { %863 = vset.pattern.permute.xlu1 %v888_v11 }
  0x19   : > { %411 = vrot.lane.b32.xlu0 %v973_v7, %s887_s21  ;;  %381 = vrot.lane.b32.xlu1 %v346_v9, %s886_s20 }
  0x1d   : > { %502 = vperm.xlu0 %860, %v499_v10   ;;  %413 = vrot.lane.b32.xlu1 %v346_v9, %s887_s21 }
  0x21   : > { %861 = vset.pattern.permute.xlu0 %v889_v13  ;;  %443 = vrot.lane.b32.xlu1 %v973_v7, %s890_s28  ;;  %v464_v13 = vrot.slane %v819_v1, %v1027_v42 }
  0x22   : > { %534 = vperm.xlu0 %861, %v531_v12  }
  0x25   : > { %445 = vrot.lane.b32.xlu1 %v346_v9, %s890_s28 }
  0x26   : > { %862 = vset.pattern.permute.xlu0 %v891_v15 }
  0x27   : > { %360 = vperm.xlu0 %862, %v357_v14   ;;  %v468_v14 = vrot.slane %v819_v1, %v1030_v43 }
  0x29   : > { %566 = vperm.xlu1 %863, %v563_v16  }
  0x2b   : > { %494 = vrot.lane.b32.xlu0 %v346_v9, %s892_s7 }
  0x2d   : > { %492 = vrot.lane.b32.xlu1 %v973_v7, %s892_s7 }
  0x2e   : > { %864 = vset.pattern.permute.xlu1 %v894_v17 }
  0x2f   : > { %524 = vrot.lane.b32.xlu0 %v973_v7, %s893_s10 }
  0x31   : > { %598 = vperm.xlu1 %864, %v595_v18  }
  0x33   : > { %556 = vrot.lane.b32.xlu0 %v973_v7, %s895_s13 }
  0x35   : > { %526 = vrot.lane.b32.xlu1 %v346_v9, %s893_s10 }
  0x36   : > { %865 = vset.pattern.permute.xlu1 %v891_v15 }
  0x37   : > { %588 = vrot.lane.b32.xlu0 %v973_v7, %s896_s14 }
  0x39   : > { %558 = vrot.lane.b32.xlu1 %v346_v9, %s895_s13 }
  0x3b   : > { %623 = vperm.xlu0 %862, %v620_v19  }
  0x3d   : > { %590 = vrot.lane.b32.xlu1 %v346_v9, %s896_s14 }
  0x3f   : > { %867 = vset.pattern.permute.xlu0 %v880_v2 }
  0x40   : > { %661 = vperm.xlu0 %867, %v628_v20  }
  0x41   : > { %631 = vperm.xlu1 %865, %v628_v20  }
  0x44   : > { %870 = vset.pattern.permute.xlu0 %v891_v15 }
  0x45   : > { %866 = vset.pattern.permute.xlu1 %v881_v3 }
  0x46   : > { %645 = vperm.xlu1 %866, %v628_v20  }
  0x4a   : > { %868 = vset.pattern.permute.xlu1 %v882_v5  ;;  %v432_v5 = vrot.slane %v818_v59, %v1027_v42  ;;  %v823_v59 = vld [vmem:[%s1112_s1 + $0x10] ss:$8 sm:$0x3] }
  0x4b   : > { %677 = vperm.xlu1 %868, %v628_v20  }
  0x4f   : > { %869 = vset.pattern.permute.xlu1 %v891_v15 }
  0x50   : > { %695 = vperm.xlu1 %869, %v692_v21  }
  0x86   : > { %v422_v22 = vpop.permute.xlu1 %421  ;;  %v390_v23 = vpop.permute.xlu0 %389 }
  0x8a   : > { %v349_v24 = vpop.permute.xlu0 %348 }
  0x8b   : > { %v454_v25 = vpop.permute.xlu1 %453 }
  0x8e   : > { %v380_v26 = vpop.permute.xlu0 %379 }
  0x90   : > { %v1011_v27 = vpop.permute.xlu1 %476 }
  0x91   : > { %v484_v20 = vrot.slane %v1011_v27, %v483_v4  ;;  %v609_v4 = vrot.slane %v823_v59, %v1027_v42 }
  0x92   : > { %v412_v28 = vpop.permute.xlu0 %411 }
  0x93   : > { %v486_v27 = vmul.f32 %v484_v20, %v973_v7 }
  0x94   : > { %v351_v29 = vpop.permute.xlu1 %350 }
  0x95   : > { %v355_v44 = vsel %vm354_vm0, %v349_v24, %v351_v29  ;;  %v356_v45 = vsel %vm354_vm0, %v351_v29, %v349_v24 }
  0x98   : > { %v382_v30 = vpop.permute.xlu1 %381 }
  0x99   : > { %v384_v47 = vsel %vm383_vm1, %v380_v26, %v382_v30  ;;  %v385_v48 = vsel %vm383_vm1, %v382_v30, %v380_v26 }
  0x9a   : > { %v392_v57 = vmul.f32 %v390_v23, %v385_v48  ;;  %v393_v58 = vmul.f32 %v390_v23, %v384_v47 }
  0x9c   : > { %v1013_v31 = vpop.permute.xlu0 %502  ;;  %v414_v33 = vpop.permute.xlu1 %413  ;;  %v407_v9 = vmul.f32 %v400_v55, %v392_v57  ;;  %v408_v10 = vmul.f32 %v404_v56, %v393_v58  ;;  %v581_v57 = vrot.slane %v822_v46, %v1030_v43 }
  0x9d   : > { %v416_v60 = vsel %vm415_vm2, %v412_v28, %v414_v33  ;;  %v417_v61 = vsel %vm415_vm2, %v414_v33, %v412_v28 }
  0x9e   : > { %v424_v11 = vmul.f32 %v422_v22, %v417_v61  ;;  %v425_v12 = vmul.f32 %v422_v22, %v416_v60  ;;  %v820_v22 = vld [vmem:[%s1112_s1 + $0x5] ss:$8 sm:$0x3] }
  0x9f   : > { %v513_v38 = vrot.slane %v820_v22, %v1027_v42  ;;  %v517_v39 = vrot.slane %v820_v22, %v1030_v43  ;;  %v666_v22 = vsub.s32 2, %v1019_v37 }
  0xa0   : > { %v444_v36 = vpop.permute.xlu1 %443  ;;  %v439_v21 = vmul.f32 %v432_v5, %v424_v11  ;;  %v440_v23 = vmul.f32 %v436_v6, %v425_v12  ;;  %v613_v5 = vrot.slane %v823_v59, %v1030_v43 }
  0xa1   : > { %v1017_v35 = vpop.permute.xlu0 %534 }
  0xa4   : > { %v446_v49 = vpop.permute.xlu1 %445 }
  0xa5   : > { %v448_v2 = vsel %vm447_vm3, %v444_v36, %v446_v49  ;;  %v449_v3 = vsel %vm447_vm3, %v446_v49, %v444_v36  ;;  %v821_v36 = vld [vmem:[%s1112_s1 + $0x6] ss:$8 sm:$0x3] }
  0xa6   : > { %v361_v41 = vpop.permute.xlu0 %360  ;;  %v456_v15 = vmul.f32 %v454_v25, %v449_v3  ;;  %v457_v16 = vmul.f32 %v454_v25, %v448_v2 }
  0xa7   : > { %v363_v52 = vmul.f32 %v361_v41, %v356_v45  ;;  %v364_v53 = vmul.f32 %v361_v41, %v355_v44  ;;  %v545_v44 = vrot.slane %v821_v36, %v1027_v42 }
  0xa8   : > { %v1048_v62 = vpop.permute.xlu1 %566  ;;  %v471_v24 = vmul.f32 %v464_v13, %v456_v15  ;;  %v472_v26 = vmul.f32 %v468_v14, %v457_v16 }
  0xa9   : > { %v377_v63 = vmul.f32 %v370_v50, %v363_v52  ;;  %v378_v0 = vmul.f32 %v374_v51, %v364_v53  ;;  %v549_v51 = vrot.slane %v821_v36, %v1030_v43 }
  0xaa   : > { %v495_v8 = vpop.permute.xlu0 %494 }
  0xab   : > { %v409_v18 = vadd.f32 %v407_v9, %v377_v63  ;;  %v410_v19 = vadd.f32 %v408_v10, %v378_v0 }
  0xac   : > { %v493_v17 = vpop.permute.xlu1 %492 }
  0xad   : > { %v441_v30 = vadd.f32 %v439_v21, %v409_v18  ;;  %v442_v32 = vadd.f32 %v440_v23, %v410_v19  ;;  %v497_v25 = vsel %vm496_vm4, %v493_v17, %v495_v8  ;;  %v498_v33 = vsel %vm496_vm4, %v495_v8, %v493_v17 }
  0xae   : > { %v525_v28 = vpop.permute.xlu0 %524  ;;  %v505_v40 = vmul.f32 %v1013_v31, %v497_v25  ;;  %v506_v41 = vmul.f32 %v1013_v31, %v498_v33  ;;  %v488_v31 = vcombine.high %v486_v27, %v486_v27 }
  0xaf   : > { %v473_v47 = vadd.f32 %v471_v24, %v441_v30  ;;  %v474_v48 = vadd.f32 %v472_v26, %v442_v32 }
  0xb0   : > { %v599_v29 = vpop.permute.xlu1 %598  ;;  %v520_v55 = vmul.f32 %v513_v38, %v505_v40  ;;  %v521_v56 = vmul.f32 %v517_v39, %v506_v41 }
  0xb1   : > { %v490_v60 = vadd.f32 %v486_v27, %v473_v47  ;;  %v491_v61 = vadd.f32 %v488_v31, %v474_v48 }
  0xb2   : > { %v557_v7 = vpop.permute.xlu0 %556 }
  0xb3   : > { %v522_v6 = vadd.f32 %v520_v55, %v490_v60  ;;  %v523_v8 = vadd.f32 %v521_v56, %v491_v61 }
  0xb4   : > { %v527_v45 = vpop.permute.xlu1 %526 }
  0xb5   : > { %v529_v49 = vsel %vm528_vm5, %v525_v28, %v527_v45  ;;  %v530_v50 = vsel %vm528_vm5, %v527_v45, %v525_v28 }
  0xb6   : > { %v537_v52 = vmul.f32 %v1017_v35, %v529_v49  ;;  %v538_v53 = vmul.f32 %v1017_v35, %v530_v50  ;;  %v589_v9 = vpop.permute.xlu0 %588 }
  0xb8   : > { %v559_v58 = vpop.permute.xlu1 %558  ;;  %v552_v0 = vmul.f32 %v545_v44, %v537_v52  ;;  %v553_v1 = vmul.f32 %v549_v51, %v538_v53 }
  0xb9   : > { %v561_v63 = vsel %vm560_vm6, %v557_v7, %v559_v58  ;;  %v562_v35 = vsel %vm560_vm6, %v559_v58, %v557_v7 }
  0xba   : > { %v569_v2 = vmul.f32 %v1048_v62, %v561_v63  ;;  %v570_v3 = vmul.f32 %v1048_v62, %v562_v35  ;;  %v554_v15 = vadd.f32 %v552_v0, %v522_v6  ;;  %v555_v16 = vadd.f32 %v553_v1, %v523_v8  ;;  %v624_v28 = vpop.permute.xlu0 %623 }
  0xbc   : > { %v584_v10 = vmul.f32 %v577_v54, %v569_v2  ;;  %v585_v11 = vmul.f32 %v581_v57, %v570_v3  ;;  %v591_v12 = vpop.permute.xlu1 %590 }
  0xbd   : > { %v593_v13 = vsel %vm592_vm7, %v589_v9, %v591_v12  ;;  %v594_v14 = vsel %vm592_vm7, %v591_v12, %v589_v9 }
  0xbe   : > { %v601_v17 = vmul.f32 %v599_v29, %v593_v13  ;;  %v602_v62 = vmul.f32 %v599_v29, %v594_v14  ;;  %v586_v18 = vadd.f32 %v584_v10, %v554_v15  ;;  %v587_v19 = vadd.f32 %v585_v11, %v555_v16 }
  0xbf   : > { %v662_v38 = vpop.permute.xlu0 %661 }
  0xc0   : > { %v616_v20 = vmul.f32 %v609_v4, %v601_v17  ;;  %v617_v21 = vmul.f32 %v613_v5, %v602_v62  ;;  %v632_v23 = vpop.permute.xlu1 %631 }
  0xc2   : > { %v618_v24 = vadd.f32 %v616_v20, %v586_v18  ;;  %v619_v26 = vadd.f32 %v617_v21, %v587_v19 }
  0xc4   : > { %v626_v30 = vadd.f32 %v624_v28, %v618_v24  ;;  %v627_v32 = vadd.f32 %v624_v28, %v619_v26 }
  0xc5   : > { %v646_v25 = vpop.permute.xlu1 %645 }
  0xc6   : > { %v637_v33 = vrot.slane %v626_v30, %v1027_v42  ;;  %v641_v36 = vrot.slane %v627_v32, %v1027_v42  ;;  %v651_v29 = vrot.slane %v626_v30, %v1030_v43  ;;  %v655_v27 = vrot.slane %v627_v32, %v1030_v43 }
  0xc7   : > { %v667_v39 = vrot.slane %v626_v30, %v666_v22  ;;  %v671_v40 = vrot.slane %v627_v32, %v666_v22  ;;  %v683_v47 = vrot.slane %v626_v30, %v682_v34  ;;  %v687_v48 = vrot.slane %v627_v32, %v682_v34 }
  0xc8   : > { %v642_v41 = vmul.f32 %v637_v33, %v632_v23  ;;  %v643_v44 = vmul.f32 %v641_v36, %v632_v23  ;;  %v656_v45 = vmul.f32 %v651_v29, %v646_v25  ;;  %v657_v46 = vmul.f32 %v655_v27, %v646_v25 }
  0xc9   : > { %v672_v50 = vmul.f32 %v667_v39, %v662_v38  ;;  %v673_v7 = vmul.f32 %v671_v40, %v662_v38 }
  0xca   : > { %v658_v49 = vadd.f32 %v656_v45, %v642_v41  ;;  %v659_v37 = vadd.f32 %v657_v46, %v643_v44  ;;  %v678_v51 = vpop.permute.xlu1 %677 }
  0xcb   : > { %v688_v42 = vmul.f32 %v683_v47, %v678_v51  ;;  %v689_v52 = vmul.f32 %v687_v48, %v678_v51 }
  0xcc   : > { %v674_v53 = vadd.f32 %v672_v50, %v658_v49  ;;  %v675_v31 = vadd.f32 %v673_v7, %v659_v37 }
  0xce   : > { %v690_v43 = vadd.f32 %v688_v42, %v674_v53  ;;  %v691_v54 = vadd.f32 %v689_v52, %v675_v31 }
  0xcf   : > { %v696_v55 = vpop.permute.xlu1 %695 }
  0xd0   : > { %v698_v56 = vadd.f32 %v696_v55, %v690_v43  ;;  %v699_v57 = vadd.f32 %v696_v55, %v691_v54 }
  0xd2   : > { %v829_v58 = vpack.c.bf16 %v699_v57, %v698_v56  ;;  %v700_v59 = vadd.f32 %v699_v57, %v698_v56  ;;  %v703_v60 = vmul.f32 %v698_v56, %v698_v56  ;;  %v704_v61 = vmul.f32 %v699_v57, %v699_v57 }
  0xd4   : > { %716 = vst [vmem:[%s339_s19] sm:$0xff] %v829_v58  ;;  %701 = vadd.xlane.f32.xlu0 %v700_v59  ;;  %v705_v63 = vadd.f32 %v704_v61, %v703_v60 }
  0xd6   : > { %706 = vadd.xlane.f32.xlu1 %v705_v63 }
 0x161   : > { %v702_v35 = vpop.xlane.xlu0 %701 }
 0x163   : > { %v707_v0 = vpop.xlane.xlu1 %706 }
 0x164   : > { %v718_v1 = vsel %vm717_vm8, %v702_v35, %v707_v0 }
 0x165   : > { %720 = vst.msk [vmem:[%s343_s22] sm:$0xff] %vm719_vm9, %v718_v1 }
 0x166 PF: > { %s20_s30 = sadd.s32 1, %s878_s30  }
 0x167   : > { %p17_p4 = scmp.ge.s32.totalorder %s20_s30, 4  }
 0x169   :  { %19 = sbr.rel (!%p17_p4) target bundleno = 1 (0x1), region = 101 }

</bundles_post_ra>
